<compile_context>
chip_gen: v5e
topology: v5e:2x2
jax: 0.10.0
libtpu: 0.0.40
codegen_flags: <defaults>
</compile_context>

<pallas_src>
import jax
import jax.numpy as jnp
from jax.experimental import pallas as pl
from jax.experimental.pallas import tpu as pltpu

BN_EPS = 1e-5
TAG_K = 3          # torch_geometric TAGConv default
LANE = 128


def _gelu(v):
    # exact GELU: 0.5 * v * (1 + erf(v / sqrt(2)))  (matches torch.nn.GELU())
    return 0.5 * v * (1.0 + jax.lax.erf(v * 0.7071067811865476))


def _node_glam_kernel(
    x_ref, adj_ref,
    bn_g_ref, bn_b_ref,
    w1_ref, b1_ref,
    t1w_ref, t1b_ref,
    w2_ref, b2_ref,
    t2w_ref, t2b_ref,
    w3x_ref, w3h_ref, b3_ref,
    w4_ref, b4_ref,
    wc_ref, bc_ref,
    a_out_ref, cl_out_ref,
):
    f32 = jnp.float32
    bf16 = jnp.bfloat16

    x = x_ref[...]          # [N, Fp] f32, lane-dense zero-padded features
    adj = adj_ref[...]      # [N, N]  bf16 (D^-1/2 A D^-1/2, no self loops)
    n = x.shape[0]
    inv_n = 1.0 / n

    # --- BatchNorm (training-mode batch stats), stable two-pass variance ---
    mean = jnp.sum(x, axis=0, keepdims=True) * inv_n
    xc = x - mean
    var = jnp.sum(xc * xc, axis=0, keepdims=True) * inv_n      # biased var
    scale = bn_g_ref[...] * jax.lax.rsqrt(var + BN_EPS)
    xn = xc * scale + bn_b_ref[...]          # padded cols stay exactly 0
    xn_bf = xn.astype(bf16)                  # reused by linear1 and the head

    # --- linear1 + GELU (bf16 x bf16 MXU, f32 accumulation) ---
    h = _gelu(jnp.dot(xn_bf, w1_ref[...], preferred_element_type=f32)
              + b1_ref[...]).astype(bf16)

    # --- TAGConv: accumulate per-hop projections, no concat stack ---
    def tag(h_in_bf, tw_ref, tb_ref):
        # tw_ref: [K+1, H_in_pad, H_out_pad] bf16 per-hop weights
        acc = jnp.dot(h_in_bf, tw_ref[0], preferred_element_type=f32)
        cur = h_in_bf
        for k in range(1, TAG_K + 1):
            cur = jnp.dot(adj, cur, preferred_element_type=f32).astype(bf16)
            acc = acc + jnp.dot(cur, tw_ref[k], preferred_element_type=f32)
        return _gelu(acc + tb_ref[...]).astype(bf16)

    h = tag(h, t1w_ref, t1b_ref)                                   # TAGConv 1
    h = _gelu(jnp.dot(h, w2_ref[...], preferred_element_type=f32)
              + b2_ref[...]).astype(bf16)
    h = tag(h, t2w_ref, t2b_ref)                                   # TAGConv 2

    # --- head: split matmul instead of materializing concat([xn, h]) ---
    a1 = _gelu(
        jnp.dot(xn_bf, w3x_ref[...], preferred_element_type=f32)
        + jnp.dot(h, w3h_ref[...], preferred_element_type=f32)
        + b3_ref[...]
    ).astype(bf16)
    a = jnp.dot(a1, w4_ref[...], preferred_element_type=f32) + b4_ref[...]
    a_out_ref[...] = a                                   # linear4 output (f32)
    cl_out_ref[...] = (
        jnp.dot(_gelu(a).astype(bf16), wc_ref[...], preferred_element_type=f32)
        + bc_ref[...]
    )


def _full_spec(shape):
    # whole-array block resident in VMEM (no grid -> index_map takes no args)
    return pl.BlockSpec(shape, lambda: (0,) * len(shape))


def _round_up(d, m=LANE):
    return ((d + m - 1) // m) * m


def _pad2(a, rows, cols, dtype=None):
    dtype = a.dtype if dtype is None else dtype
    r, c = a.shape
    return jnp.zeros((rows, cols), dtype).at[:r, :c].set(a.astype(dtype))


def _pad_tag_weight(tw, h_in_pad, h_out_pad, dtype):
    """[K+1, h_in, h_out] -> zero-padded [K+1, h_in_pad, h_out_pad] in dtype."""
    kp1, hi, ho = tw.shape
    return (jnp.zeros((kp1, h_in_pad, h_out_pad), dtype)
            .at[:, :hi, :ho].set(tw.astype(dtype)))


def _vmem_budget_bytes():
    """Per-generation VMEM request: leave headroom on 64 MiB chips (v7x),
    allow ~110 MiB on 128 MiB chips (v5e / v6e)."""
    cap = 128 * 2**20
    try:
        info = pltpu.get_tpu_info()
        cap = int(getattr(info, "vmem_capacity_bytes", cap))
    except Exception:
        pass
    if cap <= 64 * 2**20:
        return int(min(cap - 8 * 2**20, 56 * 2**20))
    return int(min(cap - 16 * 2**20, 110 * 2**20))


def node_glam_forward(x, adj, params):
    """x: [N, F] float32, adj: [N, N] dense GCN-normalized adjacency
    (bf16 preferred; any float dtype accepted)."""
    N, F = x.shape
    # TODO(synk): support N not divisible by 8 (needs masked BN statistics).
    assert N % 8 == 0, "node count must be a multiple of 8 (sublane size)"

    h5 = params["w4"].shape[1]
    out_dim = params["wc"].shape[1]

    bf16 = jnp.bfloat16
    f32 = jnp.float32

    # lane-dense padded feature widths
    FP = _round_up(F)
    H0 = _round_up(params["w1"].shape[1])
    H1 = _round_up(params["t1w"].shape[2])
    H2 = _round_up(params["w2"].shape[1])
    H3 = _round_up(params["t2w"].shape[2])
    H4 = _round_up(params["w3"].shape[1])
    H5 = _round_up(h5)
    OP = _round_up(out_dim)

    # ---- parameter prep: pad to lane multiples, bf16 weights, split w3 ----
    x_p = _pad2(x, N, FP, f32)
    bn_g = _pad2(params["bn_g"], 1, FP, f32)
    bn_b = _pad2(params["bn_b"], 1, FP, f32)

    w1p = _pad2(params["w1"], FP, H0, bf16)
    b1p = _pad2(params["b1"], 1, H0, f32)
    t1wp = _pad_tag_weight(params["t1w"], H0, H1, bf16)
    t1bp = _pad2(params["t1b"], 1, H1, f32)
    w2p = _pad2(params["w2"], H1, H2, bf16)
    b2p = _pad2(params["b2"], 1, H2, f32)
    t2wp = _pad_tag_weight(params["t2w"], H2, H3, bf16)
    t2bp = _pad2(params["t2b"], 1, H3, f32)
    w3 = params["w3"]                       # [(F + h3), h4], rows: [x | h]
    w3x = _pad2(w3[:F, :], FP, H4, bf16)
    w3h = _pad2(w3[F:, :], H3, H4, bf16)
    b3p = _pad2(params["b3"], 1, H4, f32)
    w4p = _pad2(params["w4"], H4, H5, bf16)
    b4p = _pad2(params["b4"], 1, H5, f32)
    wcp = _pad2(params["wc"], H5, OP, bf16)
    bcp = _pad2(params["bc"], 1, OP, f32)

    adj_bf = adj if adj.dtype == bf16 else adj.astype(bf16)

    operands = (
        x_p, adj_bf,
        bn_g, bn_b,
        w1p, b1p, t1wp, t1bp,
        w2p, b2p, t2wp, t2bp,
        w3x, w3h, b3p,
        w4p, b4p, wcp, bcp,
    )

    # ---- advisory cost model + per-generation VMEM budget ----
    adj_flops = 2 * N * N * TAG_K * (H0 + H2)
    dense_flops = 2 * N * (
        FP * H0 + (TAG_K + 1) * H0 * H1 + H1 * H2 + (TAG_K + 1) * H2 * H3
        + FP * H4 + H3 * H4 + H4 * H5 + H5 * OP
    )
    transcendentals = N * (H0 + H1 + H2 + H3 + H4 + H5)
    in_bytes = sum(int(op.size) * op.dtype.itemsize for op in operands)
    out_bytes = N * (H5 + OP) * 4
    vmem_limit = int(min(_vmem_budget_bytes(),
                         max(32 * 2**20, 4 * (in_bytes + out_bytes))))

    a_pad, cl_pad = pl.pallas_call(
        _node_glam_kernel,
        out_shape=(
            jax.ShapeDtypeStruct((N, H5), jnp.float32),
            jax.ShapeDtypeStruct((N, OP), jnp.float32),
        ),
        in_specs=[_full_spec(op.shape) for op in operands],
        out_specs=(
            _full_spec((N, H5)),
            _full_spec((N, OP)),
        ),
        compiler_params=pltpu.CompilerParams(vmem_limit_bytes=vmem_limit),
        cost_estimate=pl.CostEstimate(
            flops=int(adj_flops + dense_flops),
            transcendentals=int(transcendentals),
            bytes_accessed=int(in_bytes + out_bytes),
        ),
    )(*operands)

    # slice the lane-padded outputs back to the true module widths
    return a_pad[:, :h5], cl_pad[:, :out_dim]


def build_normalized_adjacency(edge_index, num_nodes, dtype=jnp.bfloat16):
    """Dense D^-1/2 A D^-1/2 (no self loops) from a [2, E] edge_index,
    produced directly in the kernel's consumption dtype (bf16 by default)."""
    src, dst = edge_index[0], edge_index[1]
    A = jnp.zeros((num_nodes, num_nodes), jnp.float32).at[dst, src].add(1.0)
    deg = A.sum(axis=1)
    dinv = jnp.where(deg > 0, 1.0 / jnp.sqrt(deg), 0.0)
    return (dinv[:, None] * A * dinv[None, :]).astype(dtype)


def init_params(key, input_, h, output_):
    ks = jax.random.split(key, 16)

    def w(k, shape, scale=0.1):
        return (scale * jax.random.normal(k, shape)).astype(jnp.float32)

    return {
        "bn_g": jnp.ones((1, input_), jnp.float32),
        "bn_b": jnp.zeros((1, input_), jnp.float32),
        "w1": w(ks[0], (input_, h[0])), "b1": w(ks[1], (1, h[0])),
        "t1w": w(ks[2], (TAG_K + 1, h[0], h[1])), "t1b": w(ks[3], (1, h[1])),
        "w2": w(ks[4], (h[1], h[2])), "b2": w(ks[5], (1, h[2])),
        "t2w": w(ks[6], (TAG_K + 1, h[2], h[3])), "t2b": w(ks[7], (1, h[3])),
        "w3": w(ks[8], (h[3] + input_, h[4])), "b3": w(ks[9], (1, h[4])),
        "w4": w(ks[10], (h[4], h[5])), "b4": w(ks[11], (1, h[5])),
        "wc": w(ks[12], (h[5], output_)), "bc": w(ks[13], (1, output_)),
    }


if __name__ == "__main__":
    key = jax.random.PRNGKey(0)
    k_x, k_p = jax.random.split(key)

    N = 16            # number of graph nodes
    input_ = 8        # input feature dim
    h = [16, 16, 16, 16, 16, 16]
    output_ = 4

    x = jax.random.normal(k_x, (N, input_), jnp.float32)

    # deterministic ring graph (undirected): edges i<->(i+1) mod N
    src = jnp.arange(N, dtype=jnp.int32)
    dst = (src + 1) % N
    edge_index = jnp.stack(
        [jnp.concatenate([src, dst]), jnp.concatenate([dst, src])], axis=0
    )
    adj = build_normalized_adjacency(edge_index, N)     # bf16 directly

    params = init_params(k_p, input_, h, output_)

    a, cl = node_glam_forward(x, adj, params)
    jax.block_until_ready((a, cl))
    assert a.shape == (N, h[5]) and cl.shape == (N, output_)
    print("KERNEL_OK")
</pallas_src>

<mosaic_0001>
module attributes {stable_mosaic.version = 11 : i64} {
  func.func @_node_glam_kernel(%arg0: memref<16x128xf32, #tpu.memory_space<vmem>>, %arg1: memref<16x16xbf16, #tpu.memory_space<vmem>>, %arg2: memref<1x128xf32, #tpu.memory_space<vmem>>, %arg3: memref<1x128xf32, #tpu.memory_space<vmem>>, %arg4: memref<128x128xbf16, #tpu.memory_space<vmem>>, %arg5: memref<1x128xf32, #tpu.memory_space<vmem>>, %arg6: memref<4x128x128xbf16, #tpu.memory_space<vmem>>, %arg7: memref<1x128xf32, #tpu.memory_space<vmem>>, %arg8: memref<128x128xbf16, #tpu.memory_space<vmem>>, %arg9: memref<1x128xf32, #tpu.memory_space<vmem>>, %arg10: memref<4x128x128xbf16, #tpu.memory_space<vmem>>, %arg11: memref<1x128xf32, #tpu.memory_space<vmem>>, %arg12: memref<128x128xbf16, #tpu.memory_space<vmem>>, %arg13: memref<128x128xbf16, #tpu.memory_space<vmem>>, %arg14: memref<1x128xf32, #tpu.memory_space<vmem>>, %arg15: memref<128x128xbf16, #tpu.memory_space<vmem>>, %arg16: memref<1x128xf32, #tpu.memory_space<vmem>>, %arg17: memref<128x128xbf16, #tpu.memory_space<vmem>>, %arg18: memref<1x128xf32, #tpu.memory_space<vmem>>, %arg19: memref<16x128xf32, #tpu.memory_space<vmem>>, %arg20: memref<16x128xf32, #tpu.memory_space<vmem>>) attributes {dimension_semantics = [], scalar_prefetch = 0 : i64, scratch_operands = 0 : i64, tpu.core_type = #tpu.core_type<tc>} {
    %c0 = arith.constant 0 : index
    %c0_0 = arith.constant 0 : index
    %0 = vector.load %arg0[%c0, %c0_0] : memref<16x128xf32, #tpu.memory_space<vmem>>, vector<16x128xf32>
    %c0_1 = arith.constant 0 : index
    %c0_2 = arith.constant 0 : index
    %1 = vector.load %arg1[%c0_1, %c0_2] : memref<16x16xbf16, #tpu.memory_space<vmem>>, vector<16x16xbf16>
    %cst = arith.constant dense<0.000000e+00> : vector<128xf32>
    %2 = vector.multi_reduction <add>, %0, %cst [0] : vector<16x128xf32> to vector<128xf32>
    %3 = vector.shape_cast %2 : vector<128xf32> to vector<1x128xf32>
    %cst_3 = arith.constant 6.250000e-02 : f32
    %4 = vector.broadcast %cst_3 : f32 to vector<1x128xf32>
    %5 = arith.mulf %3, %4 : vector<1x128xf32>
    %6 = vector.broadcast %5 : vector<1x128xf32> to vector<16x128xf32>
    %7 = arith.subf %0, %6 : vector<16x128xf32>
    %8 = arith.mulf %7, %7 : vector<16x128xf32>
    %cst_4 = arith.constant dense<0.000000e+00> : vector<128xf32>
    %9 = vector.multi_reduction <add>, %8, %cst_4 [0] : vector<16x128xf32> to vector<128xf32>
    %10 = vector.shape_cast %9 : vector<128xf32> to vector<1x128xf32>
    %cst_5 = arith.constant 6.250000e-02 : f32
    %11 = vector.broadcast %cst_5 : f32 to vector<1x128xf32>
    %12 = arith.mulf %10, %11 : vector<1x128xf32>
    %c0_6 = arith.constant 0 : index
    %c0_7 = arith.constant 0 : index
    %13 = vector.load %arg2[%c0_6, %c0_7] : memref<1x128xf32, #tpu.memory_space<vmem>>, vector<1x128xf32>
    %cst_8 = arith.constant 9.99999974E-6 : f32
    %14 = vector.broadcast %cst_8 : f32 to vector<1x128xf32>
    %15 = arith.addf %12, %14 : vector<1x128xf32>
    %16 = math.rsqrt %15 : vector<1x128xf32>
    %17 = arith.mulf %13, %16 : vector<1x128xf32>
    %18 = vector.broadcast %17 : vector<1x128xf32> to vector<16x128xf32>
    %19 = arith.mulf %7, %18 : vector<16x128xf32>
    %c0_9 = arith.constant 0 : index
    %c0_10 = arith.constant 0 : index
    %20 = vector.load %arg3[%c0_9, %c0_10] : memref<1x128xf32, #tpu.memory_space<vmem>>, vector<1x128xf32>
    %21 = vector.broadcast %20 : vector<1x128xf32> to vector<16x128xf32>
    %22 = arith.addf %19, %21 : vector<16x128xf32>
    %23 = arith.truncf %22 : vector<16x128xf32> to vector<16x128xbf16>
    %c0_11 = arith.constant 0 : index
    %c0_12 = arith.constant 0 : index
    %24 = vector.load %arg4[%c0_11, %c0_12] : memref<128x128xbf16, #tpu.memory_space<vmem>>, vector<128x128xbf16>
    %cst_13 = arith.constant dense<0.000000e+00> : vector<16x128xf32>
    %25 = tpu.matmul %23, %24, %cst_13 {dimension_numbers = #tpu.dot_dimension_numbers<[1], [0], [0], [1], [0, 0, 1, 1], [], []>} : vector<16x128xbf16>, vector<128x128xbf16>, vector<16x128xf32> -> vector<16x128xf32>
    %c0_14 = arith.constant 0 : index
    %c0_15 = arith.constant 0 : index
    %26 = vector.load %arg5[%c0_14, %c0_15] : memref<1x128xf32, #tpu.memory_space<vmem>>, vector<1x128xf32>
    %27 = vector.broadcast %26 : vector<1x128xf32> to vector<16x128xf32>
    %28 = arith.addf %25, %27 : vector<16x128xf32>
    %cst_16 = arith.constant 5.000000e-01 : f32
    %29 = vector.broadcast %cst_16 : f32 to vector<16x128xf32>
    %30 = arith.mulf %29, %28 : vector<16x128xf32>
    %cst_17 = arith.constant 0.707106769 : f32
    %31 = vector.broadcast %cst_17 : f32 to vector<16x128xf32>
    %32 = arith.mulf %28, %31 : vector<16x128xf32>
    %33 = math.erf %32 : vector<16x128xf32>
    %cst_18 = arith.constant 1.000000e+00 : f32
    %34 = vector.broadcast %cst_18 : f32 to vector<16x128xf32>
    %35 = arith.addf %34, %33 : vector<16x128xf32>
    %36 = arith.mulf %30, %35 : vector<16x128xf32>
    %37 = arith.truncf %36 : vector<16x128xf32> to vector<16x128xbf16>
    %c0_19 = arith.constant 0 : index
    %c0_20 = arith.constant 0 : index
    %c0_21 = arith.constant 0 : index
    %38 = vector.load %arg6[%c0_19, %c0_20, %c0_21] : memref<4x128x128xbf16, #tpu.memory_space<vmem>>, vector<1x128x128xbf16>
    %39 = vector.shape_cast %38 : vector<1x128x128xbf16> to vector<128x128xbf16>
    %cst_22 = arith.constant dense<0.000000e+00> : vector<16x128xf32>
    %40 = tpu.matmul %37, %39, %cst_22 {dimension_numbers = #tpu.dot_dimension_numbers<[1], [0], [0], [1], [0, 0, 1, 1], [], []>} : vector<16x128xbf16>, vector<128x128xbf16>, vector<16x128xf32> -> vector<16x128xf32>
    %cst_23 = arith.constant dense<0.000000e+00> : vector<16x128xf32>
    %41 = tpu.matmul %1, %37, %cst_23 {dimension_numbers = #tpu.dot_dimension_numbers<[1], [0], [0], [1], [0, 0, 1, 1], [], []>} : vector<16x16xbf16>, vector<16x128xbf16>, vector<16x128xf32> -> vector<16x128xf32>
    %42 = arith.truncf %41 : vector<16x128xf32> to vector<16x128xbf16>
    %c1 = arith.constant 1 : index
    %c0_24 = arith.constant 0 : index
    %c0_25 = arith.constant 0 : index
    %43 = vector.load %arg6[%c1, %c0_24, %c0_25] : memref<4x128x128xbf16, #tpu.memory_space<vmem>>, vector<1x128x128xbf16>
    %44 = vector.shape_cast %43 : vector<1x128x128xbf16> to vector<128x128xbf16>
    %cst_26 = arith.constant dense<0.000000e+00> : vector<16x128xf32>
    %45 = tpu.matmul %42, %44, %cst_26 {dimension_numbers = #tpu.dot_dimension_numbers<[1], [0], [0], [1], [0, 0, 1, 1], [], []>} : vector<16x128xbf16>, vector<128x128xbf16>, vector<16x128xf32> -> vector<16x128xf32>
    %46 = arith.addf %40, %45 : vector<16x128xf32>
    %cst_27 = arith.constant dense<0.000000e+00> : vector<16x128xf32>
    %47 = tpu.matmul %1, %42, %cst_27 {dimension_numbers = #tpu.dot_dimension_numbers<[1], [0], [0], [1], [0, 0, 1, 1], [], []>} : vector<16x16xbf16>, vector<16x128xbf16>, vector<16x128xf32> -> vector<16x128xf32>
    %48 = arith.truncf %47 : vector<16x128xf32> to vector<16x128xbf16>
    %c2 = arith.constant 2 : index
    %c0_28 = arith.constant 0 : index
    %c0_29 = arith.constant 0 : index
    %49 = vector.load %arg6[%c2, %c0_28, %c0_29] : memref<4x128x128xbf16, #tpu.memory_space<vmem>>, vector<1x128x128xbf16>
    %50 = vector.shape_cast %49 : vector<1x128x128xbf16> to vector<128x128xbf16>
    %cst_30 = arith.constant dense<0.000000e+00> : vector<16x128xf32>
    %51 = tpu.matmul %48, %50, %cst_30 {dimension_numbers = #tpu.dot_dimension_numbers<[1], [0], [0], [1], [0, 0, 1, 1], [], []>} : vector<16x128xbf16>, vector<128x128xbf16>, vector<16x128xf32> -> vector<16x128xf32>
    %52 = arith.addf %46, %51 : vector<16x128xf32>
    %cst_31 = arith.constant dense<0.000000e+00> : vector<16x128xf32>
    %53 = tpu.matmul %1, %48, %cst_31 {dimension_numbers = #tpu.dot_dimension_numbers<[1], [0], [0], [1], [0, 0, 1, 1], [], []>} : vector<16x16xbf16>, vector<16x128xbf16>, vector<16x128xf32> -> vector<16x128xf32>
    %54 = arith.truncf %53 : vector<16x128xf32> to vector<16x128xbf16>
    %c3 = arith.constant 3 : index
    %c0_32 = arith.constant 0 : index
    %c0_33 = arith.constant 0 : index
    %55 = vector.load %arg6[%c3, %c0_32, %c0_33] : memref<4x128x128xbf16, #tpu.memory_space<vmem>>, vector<1x128x128xbf16>
    %56 = vector.shape_cast %55 : vector<1x128x128xbf16> to vector<128x128xbf16>
    %cst_34 = arith.constant dense<0.000000e+00> : vector<16x128xf32>
    %57 = tpu.matmul %54, %56, %cst_34 {dimension_numbers = #tpu.dot_dimension_numbers<[1], [0], [0], [1], [0, 0, 1, 1], [], []>} : vector<16x128xbf16>, vector<128x128xbf16>, vector<16x128xf32> -> vector<16x128xf32>
    %58 = arith.addf %52, %57 : vector<16x128xf32>
    %c0_35 = arith.constant 0 : index
    %c0_36 = arith.constant 0 : index
    %59 = vector.load %arg7[%c0_35, %c0_36] : memref<1x128xf32, #tpu.memory_space<vmem>>, vector<1x128xf32>
    %60 = vector.broadcast %59 : vector<1x128xf32> to vector<16x128xf32>
    %61 = arith.addf %58, %60 : vector<16x128xf32>
    %cst_37 = arith.constant 5.000000e-01 : f32
    %62 = vector.broadcast %cst_37 : f32 to vector<16x128xf32>
    %63 = arith.mulf %62, %61 : vector<16x128xf32>
    %cst_38 = arith.constant 0.707106769 : f32
    %64 = vector.broadcast %cst_38 : f32 to vector<16x128xf32>
    %65 = arith.mulf %61, %64 : vector<16x128xf32>
    %66 = math.erf %65 : vector<16x128xf32>
    %cst_39 = arith.constant 1.000000e+00 : f32
    %67 = vector.broadcast %cst_39 : f32 to vector<16x128xf32>
    %68 = arith.addf %67, %66 : vector<16x128xf32>
    %69 = arith.mulf %63, %68 : vector<16x128xf32>
    %70 = arith.truncf %69 : vector<16x128xf32> to vector<16x128xbf16>
    %c0_40 = arith.constant 0 : index
    %c0_41 = arith.constant 0 : index
    %71 = vector.load %arg8[%c0_40, %c0_41] : memref<128x128xbf16, #tpu.memory_space<vmem>>, vector<128x128xbf16>
    %cst_42 = arith.constant dense<0.000000e+00> : vector<16x128xf32>
    %72 = tpu.matmul %70, %71, %cst_42 {dimension_numbers = #tpu.dot_dimension_numbers<[1], [0], [0], [1], [0, 0, 1, 1], [], []>} : vector<16x128xbf16>, vector<128x128xbf16>, vector<16x128xf32> -> vector<16x128xf32>
    %c0_43 = arith.constant 0 : index
    %c0_44 = arith.constant 0 : index
    %73 = vector.load %arg9[%c0_43, %c0_44] : memref<1x128xf32, #tpu.memory_space<vmem>>, vector<1x128xf32>
    %74 = vector.broadcast %73 : vector<1x128xf32> to vector<16x128xf32>
    %75 = arith.addf %72, %74 : vector<16x128xf32>
    %cst_45 = arith.constant 5.000000e-01 : f32
    %76 = vector.broadcast %cst_45 : f32 to vector<16x128xf32>
    %77 = arith.mulf %76, %75 : vector<16x128xf32>
    %cst_46 = arith.constant 0.707106769 : f32
    %78 = vector.broadcast %cst_46 : f32 to vector<16x128xf32>
    %79 = arith.mulf %75, %78 : vector<16x128xf32>
    %80 = math.erf %79 : vector<16x128xf32>
    %cst_47 = arith.constant 1.000000e+00 : f32
    %81 = vector.broadcast %cst_47 : f32 to vector<16x128xf32>
    %82 = arith.addf %81, %80 : vector<16x128xf32>
    %83 = arith.mulf %77, %82 : vector<16x128xf32>
    %84 = arith.truncf %83 : vector<16x128xf32> to vector<16x128xbf16>
    %c0_48 = arith.constant 0 : index
    %c0_49 = arith.constant 0 : index
    %c0_50 = arith.constant 0 : index
    %85 = vector.load %arg10[%c0_48, %c0_49, %c0_50] : memref<4x128x128xbf16, #tpu.memory_space<vmem>>, vector<1x128x128xbf16>
    %86 = vector.shape_cast %85 : vector<1x128x128xbf16> to vector<128x128xbf16>
    %cst_51 = arith.constant dense<0.000000e+00> : vector<16x128xf32>
    %87 = tpu.matmul %84, %86, %cst_51 {dimension_numbers = #tpu.dot_dimension_numbers<[1], [0], [0], [1], [0, 0, 1, 1], [], []>} : vector<16x128xbf16>, vector<128x128xbf16>, vector<16x128xf32> -> vector<16x128xf32>
    %cst_52 = arith.constant dense<0.000000e+00> : vector<16x128xf32>
    %88 = tpu.matmul %1, %84, %cst_52 {dimension_numbers = #tpu.dot_dimension_numbers<[1], [0], [0], [1], [0, 0, 1, 1], [], []>} : vector<16x16xbf16>, vector<16x128xbf16>, vector<16x128xf32> -> vector<16x128xf32>
    %89 = arith.truncf %88 : vector<16x128xf32> to vector<16x128xbf16>
    %c1_53 = arith.constant 1 : index
    %c0_54 = arith.constant 0 : index
    %c0_55 = arith.constant 0 : index
    %90 = vector.load %arg10[%c1_53, %c0_54, %c0_55] : memref<4x128x128xbf16, #tpu.memory_space<vmem>>, vector<1x128x128xbf16>
    %91 = vector.shape_cast %90 : vector<1x128x128xbf16> to vector<128x128xbf16>
    %cst_56 = arith.constant dense<0.000000e+00> : vector<16x128xf32>
    %92 = tpu.matmul %89, %91, %cst_56 {dimension_numbers = #tpu.dot_dimension_numbers<[1], [0], [0], [1], [0, 0, 1, 1], [], []>} : vector<16x128xbf16>, vector<128x128xbf16>, vector<16x128xf32> -> vector<16x128xf32>
    %93 = arith.addf %87, %92 : vector<16x128xf32>
    %cst_57 = arith.constant dense<0.000000e+00> : vector<16x128xf32>
    %94 = tpu.matmul %1, %89, %cst_57 {dimension_numbers = #tpu.dot_dimension_numbers<[1], [0], [0], [1], [0, 0, 1, 1], [], []>} : vector<16x16xbf16>, vector<16x128xbf16>, vector<16x128xf32> -> vector<16x128xf32>
    %95 = arith.truncf %94 : vector<16x128xf32> to vector<16x128xbf16>
    %c2_58 = arith.constant 2 : index
    %c0_59 = arith.constant 0 : index
    %c0_60 = arith.constant 0 : index
    %96 = vector.load %arg10[%c2_58, %c0_59, %c0_60] : memref<4x128x128xbf16, #tpu.memory_space<vmem>>, vector<1x128x128xbf16>
    %97 = vector.shape_cast %96 : vector<1x128x128xbf16> to vector<128x128xbf16>
    %cst_61 = arith.constant dense<0.000000e+00> : vector<16x128xf32>
    %98 = tpu.matmul %95, %97, %cst_61 {dimension_numbers = #tpu.dot_dimension_numbers<[1], [0], [0], [1], [0, 0, 1, 1], [], []>} : vector<16x128xbf16>, vector<128x128xbf16>, vector<16x128xf32> -> vector<16x128xf32>
    %99 = arith.addf %93, %98 : vector<16x128xf32>
    %cst_62 = arith.constant dense<0.000000e+00> : vector<16x128xf32>
    %100 = tpu.matmul %1, %95, %cst_62 {dimension_numbers = #tpu.dot_dimension_numbers<[1], [0], [0], [1], [0, 0, 1, 1], [], []>} : vector<16x16xbf16>, vector<16x128xbf16>, vector<16x128xf32> -> vector<16x128xf32>
    %101 = arith.truncf %100 : vector<16x128xf32> to vector<16x128xbf16>
    %c3_63 = arith.constant 3 : index
    %c0_64 = arith.constant 0 : index
    %c0_65 = arith.constant 0 : index
    %102 = vector.load %arg10[%c3_63, %c0_64, %c0_65] : memref<4x128x128xbf16, #tpu.memory_space<vmem>>, vector<1x128x128xbf16>
    %103 = vector.shape_cast %102 : vector<1x128x128xbf16> to vector<128x128xbf16>
    %cst_66 = arith.constant dense<0.000000e+00> : vector<16x128xf32>
    %104 = tpu.matmul %101, %103, %cst_66 {dimension_numbers = #tpu.dot_dimension_numbers<[1], [0], [0], [1], [0, 0, 1, 1], [], []>} : vector<16x128xbf16>, vector<128x128xbf16>, vector<16x128xf32> -> vector<16x128xf32>
    %105 = arith.addf %99, %104 : vector<16x128xf32>
    %c0_67 = arith.constant 0 : index
    %c0_68 = arith.constant 0 : index
    %106 = vector.load %arg11[%c0_67, %c0_68] : memref<1x128xf32, #tpu.memory_space<vmem>>, vector<1x128xf32>
    %107 = vector.broadcast %106 : vector<1x128xf32> to vector<16x128xf32>
    %108 = arith.addf %105, %107 : vector<16x128xf32>
    %cst_69 = arith.constant 5.000000e-01 : f32
    %109 = vector.broadcast %cst_69 : f32 to vector<16x128xf32>
    %110 = arith.mulf %109, %108 : vector<16x128xf32>
    %cst_70 = arith.constant 0.707106769 : f32
    %111 = vector.broadcast %cst_70 : f32 to vector<16x128xf32>
    %112 = arith.mulf %108, %111 : vector<16x128xf32>
    %113 = math.erf %112 : vector<16x128xf32>
    %cst_71 = arith.constant 1.000000e+00 : f32
    %114 = vector.broadcast %cst_71 : f32 to vector<16x128xf32>
    %115 = arith.addf %114, %113 : vector<16x128xf32>
    %116 = arith.mulf %110, %115 : vector<16x128xf32>
    %117 = arith.truncf %116 : vector<16x128xf32> to vector<16x128xbf16>
    %c0_72 = arith.constant 0 : index
    %c0_73 = arith.constant 0 : index
    %118 = vector.load %arg12[%c0_72, %c0_73] : memref<128x128xbf16, #tpu.memory_space<vmem>>, vector<128x128xbf16>
    %cst_74 = arith.constant dense<0.000000e+00> : vector<16x128xf32>
    %119 = tpu.matmul %23, %118, %cst_74 {dimension_numbers = #tpu.dot_dimension_numbers<[1], [0], [0], [1], [0, 0, 1, 1], [], []>} : vector<16x128xbf16>, vector<128x128xbf16>, vector<16x128xf32> -> vector<16x128xf32>
    %c0_75 = arith.constant 0 : index
    %c0_76 = arith.constant 0 : index
    %120 = vector.load %arg13[%c0_75, %c0_76] : memref<128x128xbf16, #tpu.memory_space<vmem>>, vector<128x128xbf16>
    %cst_77 = arith.constant dense<0.000000e+00> : vector<16x128xf32>
    %121 = tpu.matmul %117, %120, %cst_77 {dimension_numbers = #tpu.dot_dimension_numbers<[1], [0], [0], [1], [0, 0, 1, 1], [], []>} : vector<16x128xbf16>, vector<128x128xbf16>, vector<16x128xf32> -> vector<16x128xf32>
    %122 = arith.addf %119, %121 : vector<16x128xf32>
    %c0_78 = arith.constant 0 : index
    %c0_79 = arith.constant 0 : index
    %123 = vector.load %arg14[%c0_78, %c0_79] : memref<1x128xf32, #tpu.memory_space<vmem>>, vector<1x128xf32>
    %124 = vector.broadcast %123 : vector<1x128xf32> to vector<16x128xf32>
    %125 = arith.addf %122, %124 : vector<16x128xf32>
    %cst_80 = arith.constant 5.000000e-01 : f32
    %126 = vector.broadcast %cst_80 : f32 to vector<16x128xf32>
    %127 = arith.mulf %126, %125 : vector<16x128xf32>
    %cst_81 = arith.constant 0.707106769 : f32
    %128 = vector.broadcast %cst_81 : f32 to vector<16x128xf32>
    %129 = arith.mulf %125, %128 : vector<16x128xf32>
    %130 = math.erf %129 : vector<16x128xf32>
    %cst_82 = arith.constant 1.000000e+00 : f32
    %131 = vector.broadcast %cst_82 : f32 to vector<16x128xf32>
    %132 = arith.addf %131, %130 : vector<16x128xf32>
    %133 = arith.mulf %127, %132 : vector<16x128xf32>
    %134 = arith.truncf %133 : vector<16x128xf32> to vector<16x128xbf16>
    %c0_83 = arith.constant 0 : index
    %c0_84 = arith.constant 0 : index
    %135 = vector.load %arg15[%c0_83, %c0_84] : memref<128x128xbf16, #tpu.memory_space<vmem>>, vector<128x128xbf16>
    %cst_85 = arith.constant dense<0.000000e+00> : vector<16x128xf32>
    %136 = tpu.matmul %134, %135, %cst_85 {dimension_numbers = #tpu.dot_dimension_numbers<[1], [0], [0], [1], [0, 0, 1, 1], [], []>} : vector<16x128xbf16>, vector<128x128xbf16>, vector<16x128xf32> -> vector<16x128xf32>
    %c0_86 = arith.constant 0 : index
    %c0_87 = arith.constant 0 : index
    %137 = vector.load %arg16[%c0_86, %c0_87] : memref<1x128xf32, #tpu.memory_space<vmem>>, vector<1x128xf32>
    %138 = vector.broadcast %137 : vector<1x128xf32> to vector<16x128xf32>
    %139 = arith.addf %136, %138 : vector<16x128xf32>
    %c0_88 = arith.constant 0 : index
    %c0_89 = arith.constant 0 : index
    %140 = vector.load %arg19[%c0_88, %c0_89] : memref<16x128xf32, #tpu.memory_space<vmem>>, vector<16x128xf32>
    tpu.vector_store %arg19[%c0_88, %c0_89], %139 {strides = array<i32>} : memref<16x128xf32, #tpu.memory_space<vmem>>, vector<16x128xf32>,
    %cst_90 = arith.constant 5.000000e-01 : f32
    %141 = vector.broadcast %cst_90 : f32 to vector<16x128xf32>
    %142 = arith.mulf %141, %139 : vector<16x128xf32>
    %cst_91 = arith.constant 0.707106769 : f32
    %143 = vector.broadcast %cst_91 : f32 to vector<16x128xf32>
    %144 = arith.mulf %139, %143 : vector<16x128xf32>
    %145 = math.erf %144 : vector<16x128xf32>
    %cst_92 = arith.constant 1.000000e+00 : f32
    %146 = vector.broadcast %cst_92 : f32 to vector<16x128xf32>
    %147 = arith.addf %146, %145 : vector<16x128xf32>
    %148 = arith.mulf %142, %147 : vector<16x128xf32>
    %149 = arith.truncf %148 : vector<16x128xf32> to vector<16x128xbf16>
    %c0_93 = arith.constant 0 : index
    %c0_94 = arith.constant 0 : index
    %150 = vector.load %arg17[%c0_93, %c0_94] : memref<128x128xbf16, #tpu.memory_space<vmem>>, vector<128x128xbf16>
    %cst_95 = arith.constant dense<0.000000e+00> : vector<16x128xf32>
    %151 = tpu.matmul %149, %150, %cst_95 {dimension_numbers = #tpu.dot_dimension_numbers<[1], [0], [0], [1], [0, 0, 1, 1], [], []>} : vector<16x128xbf16>, vector<128x128xbf16>, vector<16x128xf32> -> vector<16x128xf32>
    %c0_96 = arith.constant 0 : index
    %c0_97 = arith.constant 0 : index
    %152 = vector.load %arg18[%c0_96, %c0_97] : memref<1x128xf32, #tpu.memory_space<vmem>>, vector<1x128xf32>
    %153 = vector.broadcast %152 : vector<1x128xf32> to vector<16x128xf32>
    %154 = arith.addf %151, %153 : vector<16x128xf32>
    %c0_98 = arith.constant 0 : index
    %c0_99 = arith.constant 0 : index
    %155 = vector.load %arg20[%c0_98, %c0_99] : memref<16x128xf32, #tpu.memory_space<vmem>>, vector<16x128xf32>
    tpu.vector_store %arg20[%c0_98, %c0_99], %154 {strides = array<i32>} : memref<16x128xf32, #tpu.memory_space<vmem>>, vector<16x128xf32>,
    return
  }
}

</mosaic_0001>

<bundles_post_ra>
// kernel: tpu_custom_call.1
= control target key start
LH: loop header
LB: loop body
LE: loop exit
PB: predicated region body
PF: predicated region fallthrough
CT: control target
= control target key end

     0   :  { %s3388_s0 = inlined_call_operand.hbm [shape: f32[16,128], index: 0, kind: input, shape index: {}]   ;;  %s3389_s1 = inlined_call_operand.hbm [shape: bf16[16,16], index: 1, kind: input, shape index: {}]   ;;  %s3390_s2 = inlined_call_operand.vmem [shape: f32[1,128], index: 2, kind: input, shape index: {}]   ;;  %s3391_s3 = inlined_call_operand.vmem [shape: f32[1,128], index: 3, kind: input, shape index: {}]   ;;  %s3392_s4 = inlined_call_operand.hbm [shape: bf16[128,128], index: 4, kind: input, shape index: {}]   ;;  %s3393_s5 = inlined_call_operand.vmem [shape: f32[1,128], index: 5, kind: input, shape index: {}]   ;;  %s3394_s6 = inlined_call_operand.hbm [shape: bf16[4,128,128], index: 6, kind: input, shape index: {}]   ;;  %s3395_s7 = inlined_call_operand.vmem [shape: f32[1,128], index: 7, kind: input, shape index: {}]   ;;  %s3396_s8 = inlined_call_operand.hbm [shape: bf16[128,128], index: 8, kind: input, shape index: {}]   ;;  %s3397_s9 = inlined_call_operand.vmem [shape: f32[1,128], index: 9, kind: input, shape index: {}]   ;;  %s3398_s10 = inlined_call_operand.hbm [shape: bf16[4,128,128], index: 10, kind: input, shape index: {}]   ;;  %s3399_s11 = inlined_call_operand.vmem [shape: f32[1,128], index: 11, kind: input, shape index: {}]   ;;  %s3400_s12 = inlined_call_operand.hbm [shape: bf16[128,128], index: 12, kind: input, shape index: {}]   ;;  %s3401_s13 = inlined_call_operand.hbm [shape: bf16[128,128], index: 13, kind: input, shape index: {}]   ;;  %s3402_s14 = inlined_call_operand.vmem [shape: f32[1,128], index: 14, kind: input, shape index: {}]   ;;  %s3403_s15 = inlined_call_operand.hbm [shape: bf16[128,128], index: 15, kind: input, shape index: {}]   ;;  %s3404_s16 = inlined_call_operand.vmem [shape: f32[1,128], index: 16, kind: input, shape index: {}]   ;;  %s3405_s17 = inlined_call_operand.hbm [shape: bf16[128,128], index: 17, kind: input, shape index: {}]   ;;  %s3406_s18 = inlined_call_operand.vmem [shape: f32[1,128], index: 18, kind: input, shape index: {}]   ;;  %s3407_s19 = inlined_call_operand.hbm [shape: f32[16,128], index: 19, kind: output, shape index: {0}]   ;;  %s3408_s20 = inlined_call_operand.hbm [shape: f32[16,128], index: 20, kind: output, shape index: {1}]  }
   0x1   :  { %3409 = sst [smem:[#allocation30_spill]] %s3388_s0 }
   0x2   :  { %3410 = sst [smem:[#allocation31_spill]] %s3389_s1 }
   0x3   :  { %3411 = sst [smem:[#allocation32_spill]] %s3390_s2 }
   0x4   :  { %3412 = sst [smem:[#allocation33_spill]] %s3391_s3 }
   0x5   :  { %3413 = sst [smem:[#allocation34_spill]] %s3392_s4 }
   0x6   :  { %26 = vsyncpa [#allocation3], 0 }
   0x7   :  { %27 = vsyncpa [#allocation6], 0 }
   0x8   :  { %28 = vsyncpa [#allocation9], 0 }
   0x9   :  { %29 = vsyncpa [#allocation12], 0 }
   0xa   :  { %30 = vsyncpa [#allocation15], 0 }
   0xb   :  { %31 = vsyncpa [#allocation18], 0 }
   0xc   :  { %32 = vsyncpa [#allocation4], 0  ;;  %s3414_s23 = sld [smem:[#allocation31_spill]] }
  0x12   :  { %s51_s24 = sshll.u32 %s3414_s23, 4  ;;  %s52_s24 = int_to_ptr.hbm [resolvable:$true] %s51_s24 }
  0x13   :  { %33 = vsyncpa [#allocation21], 0  ;;  %s3028_s2 = smov [#allocation5]   ;;  %s83_s27 = sshll.u32 %s3394_s6, 4  ;;  %s84_s27 = int_to_ptr.hbm [resolvable:$true] %s83_s27 }
  0x14   :  { %s53_s25 = sshll.u32 %s3028_s2, 4  ;;  %s3029_s28 = smov 64   ;;  %s54_s25 = int_to_ptr.vmem [resolvable:$true] %s53_s25 }
  0x15   :  { %s3030_s4 = smov 4   ;;  %s3031_s29 = smov [#allocation8]  }
  0x16   :  { %59 = dma.hbm_to_vmem [thread:$0]  %s52_s24, 128, %s54_s25, [#allocation6], %s3029_s28, %s3029_s28, %s3030_s4  }
  0x17   :  { %s85_s30 = sshll.u32 %s3031_s29, 4  ;;  %s113_s1 = sshll.u32 %s3398_s10, 4  ;;  %s86_s30 = int_to_ptr.vmem [resolvable:$true] %s85_s30  ;;  %s114_s1 = int_to_ptr.hbm [resolvable:$true] %s113_s1 }
  0x18   :  { %91 = dma.hbm_to_vmem [thread:$0]  %s84_s27, 4096, %s86_s30, [#allocation9], %s3029_s28, %s3029_s28, %s3030_s4  }
  0x19   :  { %s141_s23 = sshll.u32 %s3401_s13, 4  ;;  %s3032_s2 = smov [#allocation11]   ;;  %s142_s23 = int_to_ptr.hbm [resolvable:$true] %s141_s23 }
  0x1a   :  { %s115_s3 = sshll.u32 %s3032_s2, 4  ;;  %s3033_s24 = smov [#allocation14]   ;;  %s116_s3 = int_to_ptr.vmem [resolvable:$true] %s115_s3 }
  0x1b   :  { %121 = dma.hbm_to_vmem [thread:$0]  %s114_s1, 4096, %s116_s3, [#allocation12], %s3029_s28, %s3029_s28, %s3030_s4  }
  0x1c   :  { %s143_s10 = sshll.u32 %s3033_s24, 4  ;;  %s3415_s29 = sld [smem:[#allocation30_spill]]  ;;  %s144_s10 = int_to_ptr.vmem [resolvable:$true] %s143_s10 }
  0x1d   :  { %149 = dma.hbm_to_vmem [thread:$0]  %s142_s23, 1024, %s144_s10, [#allocation15], %s3029_s28, %s3029_s28, %s3030_s4  }
  0x1e   :  { %s3034_s13 = smov [#allocation2]   ;;  %s3416_s6 = sld [smem:[#allocation34_spill]] }
  0x1f   :  { %s40_s27 = sshll.u32 %s3034_s13, 4  ;;  %s3035_s1 = smov 128   ;;  %s41_s27 = int_to_ptr.vmem [resolvable:$true] %s40_s27 }
  0x20   :  { %s3036_s2 = smov 8   ;;  %s3037_s3 = smov [#allocation7]  }
  0x21   :  { %s70_s24 = sshll.u32 %s3037_s3, 4  ;;  %s98_s23 = sshll.u32 %s3396_s8, 4  ;;  %s71_s24 = int_to_ptr.vmem [resolvable:$true] %s70_s24  ;;  %s99_s23 = int_to_ptr.hbm [resolvable:$true] %s98_s23 }
  0x22   :  { %s38_s0 = sshll.u32 %s3415_s29, 4  ;;  %s128_s13 = sshll.u32 %s3400_s12, 4  ;;  %s39_s0 = int_to_ptr.hbm [resolvable:$true] %s38_s0  ;;  %s129_s13 = int_to_ptr.hbm [resolvable:$true] %s128_s13 }
  0x23   :  { %46 = dma.hbm_to_vmem [thread:$0]  %s39_s0, 256, %s41_s27, [#allocation3], %s3035_s1, %s3035_s1, %s3036_s2  }
  0x24   :  { %s68_s22 = sshll.u32 %s3416_s6, 4  ;;  %s3038_s30 = smov [#allocation10]   ;;  %s69_s22 = int_to_ptr.hbm [resolvable:$true] %s68_s22 }
  0x25   :  { %76 = dma.hbm_to_vmem [thread:$0]  %s69_s22, 1024, %s71_s24, [#allocation6], %s3029_s28, %s3029_s28, %s3030_s4  }
  0x26   :  { %s100_s21 = sshll.u32 %s3038_s30, 4  ;;  %s3039_s0 = smov [#allocation13]   ;;  %s101_s21 = int_to_ptr.vmem [resolvable:$true] %s100_s21 }
  0x27   :  { %106 = dma.hbm_to_vmem [thread:$0]  %s99_s23, 1024, %s101_s21, [#allocation9], %s3029_s28, %s3029_s28, %s3030_s4  }
  0x28   :  { %s130_s8 = sshll.u32 %s3039_s0, 4  ;;  %s156_s3 = sshll.u32 %s3403_s15, 4  ;;  %s131_s8 = int_to_ptr.vmem [resolvable:$true] %s130_s8  ;;  %s157_s3 = int_to_ptr.hbm [resolvable:$true] %s156_s3 }
  0x29   :  { %136 = dma.hbm_to_vmem [thread:$0]  %s129_s13, 1024, %s131_s8, [#allocation12], %s3029_s28, %s3029_s28, %s3030_s4  }
  0x2a   :  { %s171_s24 = sshll.u32 %s3405_s17, 4  ;;  %s3040_s25 = smov [#allocation16]   ;;  %s172_s24 = int_to_ptr.hbm [resolvable:$true] %s171_s24 }
  0x2b   :  { %s158_s26 = sshll.u32 %s3040_s25, 4  ;;  %s3041_s23 = smov [#allocation17]   ;;  %s159_s26 = int_to_ptr.vmem [resolvable:$true] %s158_s26 }
  0x2c   :  { %164 = dma.hbm_to_vmem [thread:$0]  %s157_s3, 1024, %s159_s26, [#allocation15], %s3029_s28, %s3029_s28, %s3030_s4  }
  0x2d   :  { %s173_s15 = sshll.u32 %s3041_s23, 4  ;;  %s174_s15 = int_to_ptr.vmem [resolvable:$true] %s173_s15 }
  0x2e   :  { %179 = dma.hbm_to_vmem [thread:$0]  %s172_s24, 1024, %s174_s15, [#allocation18], %s3029_s28, %s3029_s28, %s3030_s4  }
  0x2f   :  { %3012 = dma.done.wait [#allocation3], 256  }
  0x30   :  { %3013 = vsyncadd [#allocation3], 4294967040 }
  0x31   :  { %3014 = dma.done.wait [#allocation6], 1152  }
  0x32   :  { %3015 = vsyncadd [#allocation6], 4294966144 }
  0x33   :  { %3016 = dma.done.wait [#allocation9], 5120  }
  0x34   :  { %3017 = vsyncadd [#allocation9], 4294962176 }
  0x35   :  { %3018 = dma.done.wait [#allocation12], 5120  }
  0x36   :  { %3019 = vsyncadd [#allocation12], 4294962176 }
  0x37   :  { %3020 = dma.done.wait [#allocation15], 2048  }
  0x38   :  { %3021 = vsyncadd [#allocation15], 4294965248 }
  0x39   :  { %3022 = dma.done.wait [#allocation18], 1024  }
  0x3a   :  { %3023 = vsyncadd [#allocation18], 4294966272  ;;  %v2569_v0 = vld [vmem:[#allocation7 + $0x38] sm:$0xff]  ;;  %v2568_v1 = vld [vmem:[#allocation7 + $0x30] sm:$0xff]  ;;  %s3417_s4 = sld [smem:[#allocation32_spill]]  ;;  %vm464_vm11 = vcmask 130048  }
  0x3b   :  { %340 = vmatpush.bf16.msra.mxu0 %v2569_v0  ;;  %v223_v2 = vld [vmem:[#allocation2] sm:$0xff]  ;;  %v224_v3 = vld [vmem:[#allocation2 + $0x8] sm:$0xff]  ;;  %v2566_v8 = vld [vmem:[#allocation7 + $0x20] sm:$0xff]  ;;  %s3418_s13 = sld [smem:[#allocation33_spill]]  ;;  %s2055_s25 = sshll.u32 %s3407_s19, 4  ;;  %s2056_s25 = int_to_ptr.hbm [resolvable:$true] %s2055_s25 }
  0x3c   :  { %v227_v4 = vadd.f32 %v224_v3, %v223_v2  ;;  %v2567_v5 = vld [vmem:[#allocation7 + $0x28] sm:$0xff]  ;;  %v2565_v11 = vld [vmem:[#allocation7 + $0x18] sm:$0xff]  ;;  %v2564_v14 = vld [vmem:[#allocation7 + $0x10] sm:$0xff]  ;;  %s3043_s15 = smov [#allocation20]   ;;  %s2068_s10 = sshll.u32 %s3408_s20, 4  ;;  %s2069_s10 = int_to_ptr.hbm [resolvable:$true] %s2068_s10 }
  0x3d   :  { %v2563_v18 = vld [vmem:[#allocation7 + $0x8] sm:$0xff]  ;;  %v2562_v22 = vld [vmem:[#allocation7] sm:$0xff]  ;;  %v2577_v48 = vld [vmem:[#allocation8 + $0x38] sm:$0xff]  ;;  %s2066_s17 = sshll.u32 %s3043_s15, 4  ;;  %s2067_s17 = int_to_ptr.vmem [resolvable:$true] %s2066_s17 }
  0x3e   :  { %v228_v6 = vrot.slane %v227_v4, 4  ;;  %v2691_v47 = vld [vmem:[%s3393_s5] ss:$0 sm:$0xff]  ;;  %610 = vmatpush.bf16.msra.mxu3 %v2577_v48  ;;  %v2576_v52 = vld [vmem:[#allocation8 + $0x30] sm:$0xff]  ;;  %v2574_v59 = vld [vmem:[#allocation8 + $0x20] sm:$0xff] }
  0x3f   :  { %341 = vmatpush.bf16.msra.mxu0 %v2568_v1  ;;  %v2575_v54 = vld [vmem:[#allocation8 + $0x28] sm:$0xff]  ;;  %v2573_v1 = vld [vmem:[#allocation8 + $0x18] sm:$0xff] }
  0x40   :  { %v229_v7 = vadd.f32 %v228_v6, %v227_v4  ;;  %v247_v36 = vld [vmem:[%s3417_s4] sm:$0x1] }
  0x41   :  { %v2690_v41 = vld [vmem:[%s3418_s13] ss:$0 sm:$0xff] }
  0x42   :  { %v230_v9 = vrot.slane %v229_v7, 2  ;;  %611 = vmatpush.bf16.msra.mxu3 %v2576_v52 }
  0x43   :  { %342 = vmatpush.bf16.msra.mxu0 %v2567_v5 }
  0x44   :  { %v231_v10 = vadd.f32 %v230_v9, %v229_v7  ;;  %v2572_v7 = vld [vmem:[#allocation8 + $0x10] sm:$0xff] }
  0x46   :  { %v232_v12 = vrot.slane %v231_v10, 1  ;;  %612 = vmatpush.bf16.msra.mxu3 %v2575_v54 }
  0x47   :  { %343 = vmatpush.bf16.msra.mxu0 %v2566_v8 }
  0x48   :  { %v233_v13 = vadd.f32 %v232_v12, %v231_v10 }
  0x4a   :  { %v234_v15 = vmul.f32 0.0625, %v233_v13  ;;  %613 = vmatpush.bf16.msra.mxu3 %v2574_v59 }
  0x4b   :  { %344 = vmatpush.bf16.msra.mxu0 %v2565_v11 }
  0x4c   :  { %v235_v16 = vsub.f32 %v223_v2, %v234_v15  ;;  %v236_v17 = vsub.f32 %v224_v3, %v234_v15  ;;  %v2571_v15 = vld [vmem:[#allocation8 + $0x8] sm:$0xff] }
  0x4e   :  { %v237_v19 = vmul.f32 %v235_v16, %v235_v16  ;;  %v238_v20 = vmul.f32 %v236_v17, %v236_v17  ;;  %614 = vmatpush.bf16.msra.mxu3 %v2573_v1 }
  0x4f   :  { %345 = vmatpush.bf16.msra.mxu0 %v2564_v14 }
  0x50   :  { %v239_v21 = vadd.f32 %v238_v20, %v237_v19 }
  0x52   :  { %v240_v23 = vrot.slane %v239_v21, 4  ;;  %615 = vmatpush.bf16.msra.mxu3 %v2572_v7 }
  0x53   :  { %346 = vmatpush.bf16.msra.mxu0 %v2563_v18 }
  0x54   :  { %v241_v24 = vadd.f32 %v240_v23, %v239_v21 }
  0x56   :  { %v242_v25 = vrot.slane %v241_v24, 2  ;;  %616 = vmatpush.bf16.msra.mxu3 %v2571_v15 }
  0x57   :  { %347 = vmatpush.bf16.msra.mxu0 %v2562_v22  ;;  %v2570_v22 = vld [vmem:[#allocation8] sm:$0xff] }
  0x58   :  { %v243_v26 = vadd.f32 %v242_v25, %v241_v24 }
  0x5a   :  { %v244_v27 = vrot.slane %v243_v26, 1  ;;  %617 = vmatpush.bf16.msra.mxu3 %v2570_v22 }
  0x5c   :  { %v245_v28 = vadd.f32 %v244_v27, %v243_v26 }
  0x5e   :  { %v246_v29 = vmul.f32 0.0625, %v245_v28 }
  0x60   :  { %v248_v30 = vadd.f32 1e-05, %v246_v29 }
  0x62   :  { %2698 = vrsqrt.f32 %v248_v30  ;;  %vm255_vm0 = vweird.f32 %v248_v30 }
  0x68   :  { %v2699_v31 = vpop.eup %2698 }
  0x69   :  { %v250_v32 = vmul.f32 %v2699_v31, %v248_v30  ;;  %vm256_vm1 = vweird.f32 %v2699_v31 }
  0x6a   :  { %vm257_vm2 = vmor %vm255_vm0, %vm256_vm1 }
  0x6b   :  { %v251_v33 = vmul.f32 %v2699_v31, %v250_v32 }
  0x6d   :  { %v252_v34 = vmul.f32 0.5, %v251_v33 }
  0x6f   :  { %v253_v35 = vsub.f32 1.5, %v252_v34 }
  0x71   :  { %v254_v37 = vmul.f32 %v2699_v31, %v253_v35 }
  0x73   :  { %v258_v38 = vsel %vm257_vm2, %v2699_v31, %v254_v37 }
  0x74   :  { %v259_v39 = vmul.f32 %v258_v38, %v247_v36 }
  0x76   :  { %v261_v40 = vperm.slane %v259_v39, 0 }
  0x78   :  { %v263_v42 = vmul.f32 %v261_v40, %v235_v16  ;;  %v264_v43 = vmul.f32 %v261_v40, %v236_v17 }
  0x7a   :  { %v269_v44 = vadd.f32 %v2690_v41, %v263_v42  ;;  %v270_v45 = vadd.f32 %v2690_v41, %v264_v43 }
  0x7c   :  { %v3215_v46 = vpack.c.bf16 %v270_v45, %v269_v44 }
  0x7e   :  { %348 = vmatmul.bf16.vlgmr.msra.gmra.mxu0 %v3215_v46 }
  0xfb   :  { %v349_v49 = vpop.f32.mrf.mxu0 }
  0xfc   :  { %v3221_v50 = vadd.f32 %v2691_v47, %v349_v49 }
  0xfe   :  { %v3224_v51 = vmul.f32 0.70710677, %v3221_v50 }
 0x100   :  { %v358_v53 = vmul.f32 %v3224_v51, %v3224_v51 }
 0x102   :  { %v359_v55 = vmin.f32 %v358_v53, 16.0 }
 0x103   :  { %v351_v56 = vpop.f32.mrf.mxu0 }
 0x104   :  { %v360_v57 = vmul.f32 2.1237322e-06, %v359_v55  ;;  %v3228_v58 = vadd.f32 %v2691_v47, %v351_v56  ;;  %v371_v60 = vmul.f32 3.8918573e-05, %v359_v55 }
 0x106   :  { %v361_v61 = vadd.f32 0.00028619796, %v360_v57  ;;  %v3231_v62 = vmul.f32 0.70710677, %v3228_v58  ;;  %v372_v63 = vadd.f32 0.001143296, %v371_v60 }
 0x108   :  { %v398_v0 = vmul.f32 %v3231_v62, %v3231_v62  ;;  %v362_v2 = vmul.f32 %v361_v61, %v359_v55  ;;  %v373_v3 = vmul.f32 %v372_v63, %v359_v55 }
 0x10a   :  { %v399_v4 = vmin.f32 %v398_v0, 16.0  ;;  %v374_v5 = vadd.f32 0.014752088, %v373_v3  ;;  %v363_v9 = vadd.f32 0.0036580483, %v362_v2 }
 0x10c   :  { %v400_v6 = vmul.f32 2.1237322e-06, %v399_v4  ;;  %v411_v8 = vmul.f32 3.8918573e-05, %v399_v4  ;;  %v375_v10 = vmul.f32 %v374_v5, %v359_v55  ;;  %v364_v17 = vmul.f32 %v363_v9, %v359_v55 }
 0x10d   :  { %v354_v9 = vmul.f32 0.5, %v3221_v50  ;;  %v2582_v50 = vld [vmem:[#allocation8 + $0x60] sm:$0xff] }
 0x10e   :  { %v401_v11 = vadd.f32 0.00028619796, %v400_v6  ;;  %v412_v12 = vadd.f32 0.001143296, %v411_v8  ;;  %v376_v13 = vadd.f32 0.112945676, %v375_v10 }
 0x10f   :  { %v365_v24 = vadd.f32 0.05243302, %v364_v17  ;;  %v355_v10 = vmul.f32 0.5, %v3228_v58  ;;  %v2583_v17 = vld [vmem:[#allocation8 + $0x68] sm:$0xff]  ;;  %v2581_v58 = vld [vmem:[#allocation8 + $0x58] sm:$0xff] }
 0x110   :  { %v402_v14 = vmul.f32 %v401_v11, %v399_v4  ;;  %v413_v16 = vmul.f32 %v412_v12, %v399_v4  ;;  %v377_v18 = vmul.f32 %v376_v13, %v359_v55 }
 0x111   :  { %v366_v30 = vmul.f32 %v365_v24, %v359_v55 }
 0x112   :  { %v403_v19 = vadd.f32 0.0036580483, %v402_v14  ;;  %v414_v20 = vadd.f32 0.014752088, %v413_v16  ;;  %v378_v21 = vadd.f32 0.4994258, %v377_v18 }
 0x113   :  { %v367_v34 = vadd.f32 0.18741608, %v366_v30  ;;  %v2585_v14 = vld [vmem:[#allocation8 + $0x78] sm:$0xff]  ;;  %v2580_v18 = vld [vmem:[#allocation8 + $0x50] sm:$0xff]  ;;  %v2587_v30 = vld [vmem:[#allocation8 + $0x88] sm:$0xff] }
 0x114   :  { %v415_v23 = vmul.f32 %v414_v20, %v399_v4  ;;  %v379_v25 = vmul.f32 %v378_v21, %v359_v55  ;;  %v404_v26 = vmul.f32 %v403_v19, %v399_v4  ;;  %v3239_v16 = vld [vmem:[#allocation5] sm:$0xff]  ;;  %v2579_v19 = vld [vmem:[#allocation8 + $0x48] sm:$0xff]  ;;  %v2578_v20 = vld [vmem:[#allocation8 + $0x40] sm:$0xff] }
 0x115   :  { %v368_v39 = vmul.f32 %v367_v34, %v359_v55  ;;  %v2599_v34 = vld [vmem:[#allocation8 + $0xe8] sm:$0xff] }
 0x116   :  { %v416_v27 = vadd.f32 0.112945676, %v415_v23  ;;  %v380_v28 = vadd.f32 1.0, %v379_v25  ;;  %v405_v31 = vadd.f32 0.05243302, %v404_v26  ;;  %v2593_v23 = vld [vmem:[#allocation8 + $0xb8] sm:$0xff] }
 0x117   :  { %v369_v45 = vadd.f32 1.1283791, %v368_v39  ;;  %v2592_v25 = vld [vmem:[#allocation8 + $0xb0] sm:$0xff]  ;;  %v2591_v26 = vld [vmem:[#allocation8 + $0xa8] sm:$0xff] }
 0x118   :  { %v417_v29 = vmul.f32 %v416_v27, %v399_v4  ;;  %2700 = vrcp.f32 %v380_v28  ;;  %v406_v35 = vmul.f32 %v405_v31, %v399_v4  ;;  %v392_v42 = vand.u32 2147483648, %v380_v28  ;;  %v2590_v27 = vld [vmem:[#allocation8 + $0xa0] sm:$0xff] }
 0x119   :  { %v390_v44 = vand.u32 2147483647, %v380_v28  ;;  %vm386_vm4 = vweird.f32 %v380_v28  ;;  %v370_v56 = vmul.f32 %v369_v45, %v3224_v51  ;;  %v2586_v31 = vld [vmem:[#allocation8 + $0x80] sm:$0xff] }
 0x11a   :  { %v418_v32 = vadd.f32 0.4994258, %v417_v29  ;;  %v407_v40 = vadd.f32 0.18741608, %v406_v35  ;;  %v393_v52 = vor.u32 1.1754944e-38, %v392_v42  ;;  %v2588_v29 = vld [vmem:[#allocation8 + $0x90] sm:$0xff] }
 0x11b   :  { %vm391_vm6 = vcmp.eq.f32.partialorder %v390_v44, 8.507059e+37  ;;  %v2598_v35 = vld [vmem:[#allocation8 + $0xe0] sm:$0xff] }
 0x11c   :  { %v419_v33 = vmul.f32 %v418_v32, %v399_v4  ;;  %v408_v48 = vmul.f32 %v407_v40, %v399_v4  ;;  %v2601_v32 = vld [vmem:[#allocation8 + $0xf8] sm:$0xff]  ;;  %v2596_v40 = vld [vmem:[#allocation8 + $0xd0] sm:$0xff]  ;;  %v2594_v42 = vld [vmem:[#allocation8 + $0xc0] sm:$0xff] }
 0x11e   :  { %v420_v36 = vadd.f32 1.0, %v419_v33  ;;  %v2701_v37 = vpop.eup %2700  ;;  %v409_v59 = vadd.f32 1.1283791, %v408_v48  ;;  %v2600_v33 = vld [vmem:[#allocation8 + $0xf0] sm:$0xff] }
 0x11f   :  { %v382_v38 = vmul.f32 %v2701_v37, %v380_v28  ;;  %vm387_vm3 = vweird.f32 %v2701_v37  ;;  %v2589_v28 = vld [vmem:[#allocation8 + $0x98] sm:$0xff] }
 0x120   :  { %2702 = vrcp.f32 %v420_v36  ;;  %vm388_vm5 = vmor %vm386_vm4, %vm387_vm3  ;;  %v432_v60 = vand.u32 2147483648, %v420_v36  ;;  %v430_v0 = vand.u32 2147483647, %v420_v36  ;;  %vm426_vm8 = vweird.f32 %v420_v36 }
 0x121   :  { %v383_v41 = vsub.f32 1.0, %v382_v38  ;;  %v410_v3 = vmul.f32 %v409_v59, %v3231_v62  ;;  %v2584_v62 = vld [vmem:[#allocation8 + $0x70] sm:$0xff] }
 0x122   :  { %v433_v2 = vor.u32 1.1754944e-38, %v432_v60  ;;  %vm431_vm10 = vcmp.eq.f32.partialorder %v430_v0, 8.507059e+37  ;;  %v2609_v60 = vld [vmem:[#allocation10 + $0x38] sm:$0xff] }
 0x123   :  { %v384_v43 = vmul.f32 %v2701_v37, %v383_v41  ;;  %v2595_v41 = vld [vmem:[#allocation8 + $0xc8] sm:$0xff]  ;;  %979 = vmatpush.bf16.msrb.mxu3 %v2609_v60 }
 0x125   :  { %v385_v49 = vadd.f32 %v2701_v37, %v384_v43 }
 0x126   :  { %v2703_v47 = vpop.eup %2702 }
 0x127   :  { %v422_v53 = vmul.f32 %v2703_v47, %v420_v36  ;;  %v389_v54 = vsel %vm388_vm5, %v2701_v37, %v385_v49  ;;  %vm427_vm7 = vweird.f32 %v2703_v47  ;;  %v2597_v36 = vld [vmem:[#allocation8 + $0xd8] sm:$0xff] }
 0x128   :  { %v394_v57 = vsel %vm391_vm6, %v393_v52, %v389_v54  ;;  %vm428_vm9 = vmor %vm426_vm8, %vm427_vm7 }
 0x129   :  { %v423_v55 = vsub.f32 1.0, %v422_v53  ;;  %v395_v61 = vmul.f32 %v394_v57, %v370_v56  ;;  %v2692_v56 = vld [vmem:[%s3395_s7] ss:$0 sm:$0xff] }
 0x12b   :  { %v424_v63 = vmul.f32 %v2703_v47, %v423_v55  ;;  %v2123_v4 = vclamps-f32 %v395_v61, 1.0 }
 0x12d   :  { %v425_v1 = vadd.f32 %v2703_v47, %v424_v63  ;;  %v438_v8 = vadd.f32 1.0, %v2123_v4  ;;  %v2608_v4 = vld [vmem:[#allocation10 + $0x30] sm:$0xff] }
 0x12e   :  { %980 = vmatpush.bf16.msrb.mxu3 %v2608_v4 }
 0x12f   :  { %v429_v5 = vsel %vm428_vm9, %v2703_v47, %v425_v1  ;;  %v440_v12 = vmul.f32 %v438_v8, %v354_v9 }
 0x130   :  { %v434_v6 = vsel %vm431_vm10, %v433_v2, %v429_v5 }
 0x131   :  { %v435_v7 = vmul.f32 %v434_v6, %v410_v3 }
 0x133   :  { %v2124_v51 = vclamps-f32 %v435_v7, 1.0 }
 0x135   :  { %v439_v11 = vadd.f32 1.0, %v2124_v51 }
 0x137   :  { %v441_v13 = vmul.f32 %v439_v11, %v355_v10  ;;  %v2607_v10 = vld [vmem:[#allocation10 + $0x28] sm:$0xff] }
 0x138   :  { %981 = vmatpush.bf16.msrb.mxu3 %v2607_v10 }
 0x139   :  { %v442_v15 = vpack.c.bf16 %v441_v13, %v440_v12 }
 0x13b   :  { %475 = vmatpush.bf16.msra.mxu2 %v442_v15  ;;  %618 = vmatmul.bf16.vlgmr.msra.gmra.mxu3 %v442_v15  ;;  %v2606_v15 = vld [vmem:[#allocation10 + $0x20] sm:$0xff] }
 0x13c   :  { %982 = vmatpush.bf16.msrb.mxu3 %v2606_v15 }
 0x13e   :  { %2129 = vmatmul.msk.bf16.vlgmr.msra.gmra.mxu2 %vm464_vm11, %v3239_v16 }
 0x13f   :  { %548 = vmatpush.bf16.msrb.mxu2 %v2585_v14 }
 0x143   :  { %549 = vmatpush.bf16.msrb.mxu2 %v2584_v62 }
 0x147   :  { %550 = vmatpush.bf16.msrb.mxu2 %v2583_v17 }
 0x14b   :  { %551 = vmatpush.bf16.msrb.mxu2 %v2582_v50 }
 0x14f   :  { %552 = vmatpush.bf16.msrb.mxu2 %v2581_v58 }
 0x153   :  { %553 = vmatpush.bf16.msrb.mxu2 %v2580_v18 }
 0x157   :  { %554 = vmatpush.bf16.msrb.mxu2 %v2579_v19  ;;  %v2605_v19 = vld [vmem:[#allocation10 + $0x18] sm:$0xff] }
 0x158   :  { %983 = vmatpush.bf16.msrb.mxu3 %v2605_v19 }
 0x15b   :  { %555 = vmatpush.bf16.msrb.mxu2 %v2578_v20 }
 0x15f   :  { %800 = vmatpush.bf16.msra.mxu2 %v2601_v32  ;;  %v2603_v32 = vld [vmem:[#allocation10 + $0x8] sm:$0xff] }
 0x163   :  { %801 = vmatpush.bf16.msra.mxu2 %v2600_v33 }
 0x167   :  { %802 = vmatpush.bf16.msra.mxu2 %v2599_v34 }
 0x16b   :  { %803 = vmatpush.bf16.msra.mxu2 %v2598_v35 }
 0x16f   :  { %804 = vmatpush.bf16.msra.mxu2 %v2597_v36 }
 0x173   :  { %805 = vmatpush.bf16.msra.mxu2 %v2596_v40 }
 0x177   :  { %806 = vmatpush.bf16.msra.mxu2 %v2595_v41 }
 0x17b   :  { %807 = vmatpush.bf16.msra.mxu2 %v2594_v42 }
 0x1be   :  { %v619_v49 = vpop.f32.mrf.mxu3 }
 0x1c1   :  { %v477_v21 = vpop.f32.mrf.mxu2 }
 0x1c6   :  { %v621_v61 = vpop.f32.mrf.mxu3 }
 0x1c9   :  { %v479_v22 = vpop.f32.mrf.mxu2 }
 0x1ca   :  { %v482_v24 = vpack.c.bf16 %v479_v22, %v477_v21 }
 0x1cc   :  { %556 = vmatmul.bf16.vlgmr.msrb.gmra.mxu2 %v482_v24  ;;  %631 = vmatpush.bf16.msra.mxu1 %v482_v24 }
 0x1cf   :  { %2194 = vmatmul.msk.bf16.vlgmr.msra.gmra.mxu1 %vm464_vm11, %v3239_v16 }
 0x1d0   :  { %704 = vmatpush.bf16.msrb.mxu1 %v2593_v23 }
 0x1d4   :  { %705 = vmatpush.bf16.msrb.mxu1 %v2592_v25 }
 0x1d8   :  { %706 = vmatpush.bf16.msrb.mxu1 %v2591_v26 }
 0x1dc   :  { %707 = vmatpush.bf16.msrb.mxu1 %v2590_v27  ;;  %v2604_v27 = vld [vmem:[#allocation10 + $0x10] sm:$0xff] }
 0x1dd   :  { %984 = vmatpush.bf16.msrb.mxu3 %v2604_v27 }
 0x1e0   :  { %708 = vmatpush.bf16.msrb.mxu1 %v2589_v28 }
 0x1e1   :  { %985 = vmatpush.bf16.msrb.mxu3 %v2603_v32 }
 0x1e4   :  { %709 = vmatpush.bf16.msrb.mxu1 %v2588_v29 }
 0x1e8   :  { %710 = vmatpush.bf16.msrb.mxu1 %v2587_v30 }
 0x1ec   :  { %711 = vmatpush.bf16.msrb.mxu1 %v2586_v31 }
 0x24c   :  { %v633_v37 = vpop.f32.mrf.mxu1 }
 0x24f   :  { %v557_v47 = vpop.f32.mrf.mxu2 }
 0x250   :  { %v620_v53 = vadd.f32 %v619_v49, %v557_v47 }
 0x254   :  { %v635_v38 = vpop.f32.mrf.mxu1 }
 0x255   :  { %v638_v39 = vpack.c.bf16 %v635_v38, %v633_v37 }
 0x257   :  { %712 = vmatmul.bf16.vlgmr.msrb.gmra.mxu1 %v638_v39  ;;  %727 = vmatpush.bf16.msrb.mxu0 %v638_v39  ;;  %v559_v48 = vpop.f32.mrf.mxu2  ;;  %v2602_v39 = vld [vmem:[#allocation10] sm:$0xff] }
 0x258   :  { %v622_v0 = vadd.f32 %v621_v61, %v559_v48  ;;  %986 = vmatpush.bf16.msrb.mxu3 %v2602_v39 }
 0x25a   :  { %2227 = vmatmul.msk.bf16.vlgmr.msrb.gmra.mxu0 %vm464_vm11, %v3239_v16 }
 0x2d4   :  { %v713_v52 = vpop.f32.mrf.mxu1 }
 0x2d5   :  { %v718_v54 = vadd.f32 %v713_v52, %v620_v53 }
 0x2d7   :  { %v729_v43 = vpop.f32.mrf.mxu0 }
 0x2dc   :  { %v715_v63 = vpop.f32.mrf.mxu1 }
 0x2dd   :  { %v719_v2 = vadd.f32 %v715_v63, %v622_v0 }
 0x2df   :  { %v731_v44 = vpop.f32.mrf.mxu0 }
 0x2e0   :  { %v734_v45 = vpack.c.bf16 %v731_v44, %v729_v43 }
 0x2e2   :  { %808 = vmatmul.bf16.vlgmr.msra.gmra.mxu2 %v734_v45 }
 0x365   :  { %v809_v57 = vpop.f32.mrf.mxu2 }
 0x366   :  { %v814_v55 = vadd.f32 %v809_v57, %v718_v54 }
 0x368   :  { %v3250_v59 = vadd.f32 %v2692_v56, %v814_v55 }
 0x36a   :  { %v3253_v1 = vmul.f32 0.70710677, %v3250_v59 }
 0x36c   :  { %v826_v3 = vmul.f32 %v3253_v1, %v3253_v1 }
 0x36d   :  { %v811_v5 = vpop.f32.mrf.mxu2 }
 0x36e   :  { %v827_v6 = vmin.f32 %v826_v3, 16.0  ;;  %v815_v7 = vadd.f32 %v811_v5, %v719_v2 }
 0x370   :  { %v828_v51 = vmul.f32 2.1237322e-06, %v827_v6  ;;  %v839_v8 = vmul.f32 3.8918573e-05, %v827_v6  ;;  %v3257_v9 = vadd.f32 %v2692_v56, %v815_v7 }
 0x372   :  { %v829_v11 = vadd.f32 0.00028619796, %v828_v51  ;;  %v840_v12 = vadd.f32 0.001143296, %v839_v8  ;;  %v3260_v13 = vmul.f32 0.70710677, %v3257_v9 }
 0x374   :  { %v841_v14 = vmul.f32 %v840_v12, %v827_v6  ;;  %v866_v62 = vmul.f32 %v3260_v13, %v3260_v13  ;;  %v830_v17 = vmul.f32 %v829_v11, %v827_v6 }
 0x376   :  { %v842_v50 = vadd.f32 0.014752088, %v841_v14  ;;  %v867_v58 = vmin.f32 %v866_v62, 16.0  ;;  %v831_v22 = vadd.f32 0.0036580483, %v830_v17 }
 0x378   :  { %v843_v18 = vmul.f32 %v842_v50, %v827_v6  ;;  %v868_v20 = vmul.f32 2.1237322e-06, %v867_v58  ;;  %v879_v21 = vmul.f32 3.8918573e-05, %v867_v58  ;;  %v832_v30 = vmul.f32 %v831_v22, %v827_v6 }
 0x37a   :  { %v844_v23 = vadd.f32 0.112945676, %v843_v18  ;;  %v869_v24 = vadd.f32 0.00028619796, %v868_v20  ;;  %v880_v25 = vadd.f32 0.001143296, %v879_v21 }
 0x37b   :  { %v833_v37 = vadd.f32 0.05243302, %v832_v30 }
 0x37c   :  { %v845_v26 = vmul.f32 %v844_v23, %v827_v6  ;;  %v870_v28 = vmul.f32 %v869_v24, %v867_v58  ;;  %v881_v29 = vmul.f32 %v880_v25, %v867_v58  ;;  %v822_v23 = vmul.f32 0.5, %v3250_v59 }
 0x37d   :  { %v834_v43 = vmul.f32 %v833_v37, %v827_v6  ;;  %v823_v24 = vmul.f32 0.5, %v3257_v9 }
 0x37e   :  { %v846_v31 = vadd.f32 0.4994258, %v845_v26  ;;  %v871_v33 = vadd.f32 0.0036580483, %v870_v28  ;;  %v882_v34 = vadd.f32 0.014752088, %v881_v29 }
 0x37f   :  { %v835_v49 = vadd.f32 0.18741608, %v834_v43 }
 0x380   :  { %v847_v35 = vmul.f32 %v846_v31, %v827_v6  ;;  %v883_v36 = vmul.f32 %v882_v34, %v867_v58  ;;  %v872_v40 = vmul.f32 %v871_v33, %v867_v58 }
 0x381   :  { %v836_v57 = vmul.f32 %v835_v49, %v827_v6 }
 0x382   :  { %v848_v38 = vadd.f32 1.0, %v847_v35  ;;  %v884_v41 = vadd.f32 0.112945676, %v883_v36  ;;  %v873_v44 = vadd.f32 0.05243302, %v872_v40 }
 0x383   :  { %v837_v2 = vadd.f32 1.1283791, %v836_v57 }
 0x384   :  { %2704 = vrcp.f32 %v848_v38  ;;  %v885_v42 = vmul.f32 %v884_v41, %v867_v58  ;;  %v874_v53 = vmul.f32 %v873_v44, %v867_v58  ;;  %v860_v60 = vand.u32 2147483648, %v848_v38 }
 0x385   :  { %v858_v63 = vand.u32 2147483647, %v848_v38  ;;  %vm854_vm13 = vweird.f32 %v848_v38  ;;  %v838_v10 = vmul.f32 %v837_v2, %v3253_v1 }
 0x386   :  { %v886_v45 = vadd.f32 0.4994258, %v885_v42  ;;  %v875_v61 = vadd.f32 0.18741608, %v874_v53  ;;  %v861_v5 = vor.u32 1.1754944e-38, %v860_v60 }
 0x387   :  { %vm859_vm15 = vcmp.eq.f32.partialorder %v858_v63, 8.507059e+37 }
 0x388   :  { %v887_v47 = vmul.f32 %v886_v45, %v867_v58  ;;  %v876_v7 = vmul.f32 %v875_v61, %v867_v58 }
 0x38a   :  { %v2705_v48 = vpop.eup %2704  ;;  %v888_v54 = vadd.f32 1.0, %v887_v47  ;;  %v877_v6 = vadd.f32 1.1283791, %v876_v7 }
 0x38b   :  { %v850_v52 = vmul.f32 %v2705_v48, %v848_v38  ;;  %vm855_vm12 = vweird.f32 %v2705_v48 }
 0x38c   :  { %2706 = vrcp.f32 %v888_v54  ;;  %vm856_vm14 = vmor %vm854_vm13, %vm855_vm12  ;;  %v900_v12 = vand.u32 2147483648, %v888_v54  ;;  %v898_v62 = vand.u32 2147483647, %v888_v54  ;;  %vm894_vm1 = vweird.f32 %v888_v54 }
 0x38d   :  { %v851_v56 = vsub.f32 1.0, %v850_v52  ;;  %v878_v18 = vmul.f32 %v877_v6, %v3260_v13  ;;  %v2693_v13 = vld [vmem:[%s3397_s9] ss:$0 sm:$0xff] }
 0x38e   :  { %v901_v50 = vor.u32 1.1754944e-38, %v900_v12  ;;  %vm899_vm3 = vcmp.eq.f32.partialorder %v898_v62, 8.507059e+37 }
 0x38f   :  { %v852_v55 = vmul.f32 %v2705_v48, %v851_v56 }
 0x391   :  { %v853_v0 = vadd.f32 %v2705_v48, %v852_v55 }
 0x392   :  { %v2707_v3 = vpop.eup %2706 }
 0x393   :  { %v857_v4 = vsel %vm856_vm14, %v2705_v48, %v853_v0  ;;  %v890_v51 = vmul.f32 %v2707_v3, %v888_v54  ;;  %vm895_vm0 = vweird.f32 %v2707_v3 }
 0x394   :  { %v862_v8 = vsel %vm859_vm15, %v861_v5, %v857_v4  ;;  %vm896_vm2 = vmor %vm894_vm1, %vm895_vm0 }
 0x395   :  { %v891_v11 = vsub.f32 1.0, %v890_v51  ;;  %v863_v14 = vmul.f32 %v862_v8, %v838_v10 }
 0x397   :  { %v892_v15 = vmul.f32 %v2707_v3, %v891_v11  ;;  %v2260_v58 = vclamps-f32 %v863_v14, 1.0 }
 0x399   :  { %v893_v17 = vadd.f32 %v2707_v3, %v892_v15  ;;  %v906_v1 = vadd.f32 1.0, %v2260_v58 }
 0x39b   :  { %v897_v19 = vsel %vm896_vm2, %v2707_v3, %v893_v17  ;;  %v908_v26 = vmul.f32 %v906_v1, %v822_v23 }
 0x39c   :  { %v902_v20 = vsel %vm899_vm3, %v901_v50, %v897_v19 }
 0x39d   :  { %v903_v21 = vmul.f32 %v902_v20, %v878_v18 }
 0x39f   :  { %v2261_v22 = vclamps-f32 %v903_v21, 1.0 }
 0x3a1   :  { %v907_v25 = vadd.f32 1.0, %v2261_v22 }
 0x3a3   :  { %v909_v27 = vmul.f32 %v907_v25, %v823_v24 }
 0x3a5   :  { %v910_v28 = vpack.c.bf16 %v909_v27, %v908_v26 }
 0x3a7   :  { %987 = vmatmul.bf16.vlgmr.msrb.gmra.mxu3 %v910_v28 }
 0x42a   :  { %v988_v29 = vpop.f32.mrf.mxu3 }
 0x42b   :  { %v3271_v30 = vadd.f32 %v2693_v13, %v988_v29 }
 0x42d   :  { %v3274_v31 = vmul.f32 0.70710677, %v3271_v30 }
 0x42f   :  { %v997_v59 = vmul.f32 %v3274_v31, %v3274_v31 }
 0x431   :  { %v998_v32 = vmin.f32 %v997_v59, 16.0 }
 0x432   :  { %v990_v9 = vpop.f32.mrf.mxu3 }
 0x433   :  { %v999_v33 = vmul.f32 2.1237322e-06, %v998_v32  ;;  %v1010_v34 = vmul.f32 3.8918573e-05, %v998_v32  ;;  %v3278_v35 = vadd.f32 %v2693_v13, %v990_v9 }
 0x435   :  { %v1000_v36 = vadd.f32 0.00028619796, %v999_v33  ;;  %v1011_v37 = vadd.f32 0.001143296, %v1010_v34  ;;  %v3281_v38 = vmul.f32 0.70710677, %v3278_v35 }
 0x437   :  { %v1012_v39 = vmul.f32 %v1011_v37, %v998_v32  ;;  %v1037_v40 = vmul.f32 %v3281_v38, %v3281_v38  ;;  %v1001_v41 = vmul.f32 %v1000_v36, %v998_v32 }
 0x439   :  { %v1013_v42 = vadd.f32 0.014752088, %v1012_v39  ;;  %v1038_v43 = vmin.f32 %v1037_v40, 16.0  ;;  %v1002_v48 = vadd.f32 0.0036580483, %v1001_v41 }
 0x43b   :  { %v1014_v44 = vmul.f32 %v1013_v42, %v998_v32  ;;  %v1039_v45 = vmul.f32 2.1237322e-06, %v1038_v43  ;;  %v1050_v47 = vmul.f32 3.8918573e-05, %v1038_v43  ;;  %v1003_v55 = vmul.f32 %v1002_v48, %v998_v32 }
 0x43d   :  { %v1015_v49 = vadd.f32 0.112945676, %v1014_v44  ;;  %v1040_v52 = vadd.f32 0.00028619796, %v1039_v45  ;;  %v1051_v53 = vadd.f32 0.001143296, %v1050_v47 }
 0x43e   :  { %v1004_v3 = vadd.f32 0.05243302, %v1003_v55  ;;  %v993_v45 = vmul.f32 0.5, %v3271_v30  ;;  %v994_v47 = vmul.f32 0.5, %v3278_v35  ;;  %v2615_v55 = vld [vmem:[#allocation11 + $0x28] sm:$0xff]  ;;  %v2614_v35 = vld [vmem:[#allocation11 + $0x20] sm:$0xff] }
 0x43f   :  { %v1016_v54 = vmul.f32 %v1015_v49, %v998_v32  ;;  %v1041_v56 = vmul.f32 %v1040_v52, %v1038_v43  ;;  %v1052_v57 = vmul.f32 %v1051_v53, %v1038_v43  ;;  %v2617_v53 = vld [vmem:[#allocation11 + $0x38] sm:$0xff]  ;;  %v2623_v30 = vld [vmem:[#allocation11 + $0x68] sm:$0xff] }
 0x440   :  { %v1005_v8 = vmul.f32 %v1004_v3, %v998_v32  ;;  %v2610_v3 = vld [vmem:[#allocation11] sm:$0xff] }
 0x441   :  { %v1017_v60 = vadd.f32 0.4994258, %v1016_v54  ;;  %v1042_v61 = vadd.f32 0.0036580483, %v1041_v56  ;;  %v1053_v63 = vadd.f32 0.014752088, %v1052_v57 }
 0x442   :  { %v1006_v14 = vadd.f32 0.18741608, %v1005_v8  ;;  %v2625_v56 = vld [vmem:[#allocation11 + $0x78] sm:$0xff]  ;;  %v2616_v57 = vld [vmem:[#allocation11 + $0x30] sm:$0xff] }
 0x443   :  { %v1018_v0 = vmul.f32 %v1017_v60, %v998_v32  ;;  %v1054_v2 = vmul.f32 %v1053_v63, %v1038_v43  ;;  %v1043_v5 = vmul.f32 %v1042_v61, %v1038_v43  ;;  %1178 = vmatpush.bf16.msra.mxu1 %v2625_v56  ;;  %v2622_v60 = vld [vmem:[#allocation11 + $0x60] sm:$0xff]  ;;  %v2613_v61 = vld [vmem:[#allocation11 + $0x18] sm:$0xff] }
 0x444   :  { %v1007_v18 = vmul.f32 %v1006_v14, %v998_v32  ;;  %v2621_v63 = vld [vmem:[#allocation11 + $0x58] sm:$0xff]  ;;  %v2630_v14 = vld [vmem:[#allocation11 + $0xa0] sm:$0xff] }
 0x445   :  { %v1019_v4 = vadd.f32 1.0, %v1018_v0  ;;  %v1055_v7 = vadd.f32 0.112945676, %v1054_v2  ;;  %v1044_v10 = vadd.f32 0.05243302, %v1043_v5  ;;  %v2612_v0 = vld [vmem:[#allocation11 + $0x10] sm:$0xff] }
 0x446   :  { %v1008_v1 = vadd.f32 1.1283791, %v1007_v18  ;;  %v2611_v2 = vld [vmem:[#allocation11 + $0x8] sm:$0xff]  ;;  %v2633_v8 = vld [vmem:[#allocation11 + $0xb8] sm:$0xff] }
 0x447   :  { %2708 = vrcp.f32 %v1019_v4  ;;  %v1056_v51 = vmul.f32 %v1055_v7, %v1038_v43  ;;  %v1045_v62 = vmul.f32 %v1044_v10, %v1038_v43  ;;  %v1031_v58 = vand.u32 2147483648, %v1019_v4  ;;  %v2619_v5 = vld [vmem:[#allocation11 + $0x48] sm:$0xff]  ;;  %v2618_v7 = vld [vmem:[#allocation11 + $0x40] sm:$0xff]  ;;  %1334 = vmatpush.bf16.msra.mxu3 %v2633_v8  ;;  %v2641_v18 = vld [vmem:[#allocation11 + $0xf8] sm:$0xff] }
 0x448   :  { %v1029_v21 = vand.u32 2147483647, %v1019_v4  ;;  %vm1025_vm5 = vweird.f32 %v1019_v4  ;;  %v1009_v13 = vmul.f32 %v1008_v1, %v3274_v31 }
 0x449   :  { %v1057_v11 = vadd.f32 0.4994258, %v1056_v51  ;;  %v1046_v20 = vadd.f32 0.18741608, %v1045_v62  ;;  %v1032_v25 = vor.u32 1.1754944e-38, %v1031_v58  ;;  %v2628_v62 = vld [vmem:[#allocation11 + $0x90] sm:$0xff] }
 0x44a   :  { %vm1030_vm7 = vcmp.eq.f32.partialorder %v1029_v21, 8.507059e+37  ;;  %v2639_v58 = vld [vmem:[#allocation11 + $0xe8] sm:$0xff]  ;;  %v2637_v21 = vld [vmem:[#allocation11 + $0xd8] sm:$0xff] }
 0x44b   :  { %v1058_v6 = vmul.f32 %v1057_v11, %v1038_v43  ;;  %v1047_v26 = vmul.f32 %v1046_v20, %v1038_v43  ;;  %v2632_v11 = vld [vmem:[#allocation11 + $0xb0] sm:$0xff]  ;;  %v2638_v20 = vld [vmem:[#allocation11 + $0xe0] sm:$0xff] }
 0x44c   :  { %1335 = vmatpush.bf16.msra.mxu3 %v2632_v11 }
 0x44d   :  { %v2709_v12 = vpop.eup %2708  ;;  %v1059_v17 = vadd.f32 1.0, %v1058_v6  ;;  %v1048_v59 = vadd.f32 1.1283791, %v1047_v26  ;;  %v2634_v26 = vld [vmem:[#allocation11 + $0xc0] sm:$0xff] }
 0x44e   :  { %v1021_v15 = vmul.f32 %v2709_v12, %v1019_v4  ;;  %vm1026_vm4 = vweird.f32 %v2709_v12  ;;  %v2620_v4 = vld [vmem:[#allocation11 + $0x50] sm:$0xff] }
 0x44f   :  { %2710 = vrcp.f32 %v1059_v17  ;;  %vm1027_vm6 = vmor %vm1025_vm5, %vm1026_vm4  ;;  %v1071_v32 = vand.u32 2147483648, %v1059_v17  ;;  %v1069_v34 = vand.u32 2147483647, %v1059_v17  ;;  %vm1065_vm9 = vweird.f32 %v1059_v17 }
 0x450   :  { %v1022_v50 = vsub.f32 1.0, %v1021_v15  ;;  %v1049_v40 = vmul.f32 %v1048_v59, %v3281_v38  ;;  %v2624_v38 = vld [vmem:[#allocation11 + $0x70] sm:$0xff]  ;;  %v2629_v15 = vld [vmem:[#allocation11 + $0x98] sm:$0xff] }
 0x451   :  { %v1072_v37 = vor.u32 1.1754944e-38, %v1071_v32  ;;  %vm1070_vm12 = vcmp.eq.f32.partialorder %v1069_v34, 8.507059e+37  ;;  %1179 = vmatpush.bf16.msra.mxu1 %v2624_v38  ;;  %v2649_v59 = vld [vmem:[#allocation13 + $0x38] sm:$0xff] }
 0x452   :  { %v1023_v19 = vmul.f32 %v2709_v12, %v1022_v50  ;;  %v2626_v50 = vld [vmem:[#allocation11 + $0x80] sm:$0xff] }
 0x454   :  { %v1024_v22 = vadd.f32 %v2709_v12, %v1023_v19  ;;  %v2640_v19 = vld [vmem:[#allocation11 + $0xf0] sm:$0xff] }
 0x455   :  { %v2711_v23 = vpop.eup %2710  ;;  %1180 = vmatpush.bf16.msra.mxu1 %v2623_v30 }
 0x456   :  { %v1028_v24 = vsel %vm1027_vm6, %v2709_v12, %v1024_v22  ;;  %v1061_v27 = vmul.f32 %v2711_v23, %v1059_v17  ;;  %vm1066_vm8 = vweird.f32 %v2711_v23  ;;  %v2631_v12 = vld [vmem:[#allocation11 + $0xa8] sm:$0xff] }
 0x457   :  { %v1033_v28 = vsel %vm1030_vm7, %v1032_v25, %v1028_v24  ;;  %vm1067_vm10 = vmor %vm1065_vm9, %vm1066_vm8  ;;  %1336 = vmatpush.bf16.msra.mxu3 %v2631_v12  ;;  %v2627_v17 = vld [vmem:[#allocation11 + $0x88] sm:$0xff]  ;;  %v2636_v24 = vld [vmem:[#allocation11 + $0xd0] sm:$0xff] }
 0x458   :  { %v1062_v29 = vsub.f32 1.0, %v1061_v27  ;;  %v1034_v9 = vmul.f32 %v1033_v28, %v1009_v13  ;;  %v2635_v25 = vld [vmem:[#allocation11 + $0xc8] sm:$0xff]  ;;  %v2653_v12 = vld [vmem:[#allocation14 + $0x18] sm:$0xff] }
 0x459   :  { %1181 = vmatpush.bf16.msra.mxu1 %v2622_v60 }
 0x45a   :  { %v1063_v33 = vmul.f32 %v2711_v23, %v1062_v29  ;;  %v2294_v39 = vclamps-f32 %v1034_v9, 1.0  ;;  %v2648_v9 = vld [vmem:[#allocation13 + $0x30] sm:$0xff] }
 0x45b   :  { %1337 = vmatpush.bf16.msra.mxu3 %v2630_v14 }
 0x45c   :  { %v1064_v36 = vadd.f32 %v2711_v23, %v1063_v33  ;;  %v1077_v44 = vadd.f32 1.0, %v2294_v39  ;;  %v2694_v39 = vld [vmem:[%s3399_s11] ss:$0 sm:$0xff] }
 0x45d   :  { %1182 = vmatpush.bf16.msra.mxu1 %v2621_v63 }
 0x45e   :  { %v1068_v41 = vsel %vm1067_vm10, %v2711_v23, %v1064_v36  ;;  %v1079_v49 = vmul.f32 %v1077_v44, %v993_v45  ;;  %v2657_v44 = vld [vmem:[#allocation14 + $0x38] sm:$0xff] }
 0x45f   :  { %v1073_v42 = vsel %vm1070_vm12, %v1072_v37, %v1068_v41  ;;  %1338 = vmatpush.bf16.msra.mxu3 %v2629_v15 }
 0x460   :  { %v1074_v43 = vmul.f32 %v1073_v42, %v1049_v40  ;;  %v2646_v42 = vld [vmem:[#allocation13 + $0x20] sm:$0xff] }
 0x461   :  { %1183 = vmatpush.bf16.msra.mxu1 %v2620_v4 }
 0x462   :  { %v2295_v31 = vclamps-f32 %v1074_v43, 1.0 }
 0x463   :  { %1339 = vmatpush.bf16.msra.mxu3 %v2628_v62 }
 0x464   :  { %v1078_v48 = vadd.f32 1.0, %v2295_v31 }
 0x465   :  { %1184 = vmatpush.bf16.msra.mxu1 %v2619_v5  ;;  %v2654_v5 = vld [vmem:[#allocation14 + $0x20] sm:$0xff] }
 0x466   :  { %v1080_v52 = vmul.f32 %v1078_v48, %v994_v47 }
 0x467   :  { %1340 = vmatpush.bf16.msra.mxu3 %v2627_v17 }
 0x468   :  { %v1081_v54 = vpack.c.bf16 %v1080_v52, %v1079_v49  ;;  %v2645_v49 = vld [vmem:[#allocation13 + $0x18] sm:$0xff] }
 0x469   :  { %1185 = vmatpush.bf16.msra.mxu1 %v2618_v7 }
 0x46a   :  { %1105 = vmatpush.bf16.msra.mxu0 %v1081_v54 }
 0x46b   :  { %1341 = vmatpush.bf16.msra.mxu3 %v2626_v50 }
 0x46d   :  { %2296 = vmatmul.msk.bf16.vlgmr.msra.gmra.mxu0 %vm464_vm11, %v3239_v16  ;;  %1430 = vmatpush.bf16.msrb.mxu1 %v2641_v18 }
 0x46e   :  { %1240 = vmatpush.bf16.msrb.mxu0 %v2617_v53 }
 0x471   :  { %1431 = vmatpush.bf16.msrb.mxu1 %v2640_v19 }
 0x472   :  { %1241 = vmatpush.bf16.msrb.mxu0 %v2616_v57 }
 0x475   :  { %1432 = vmatpush.bf16.msrb.mxu1 %v2639_v58  ;;  %v2652_v58 = vld [vmem:[#allocation14 + $0x10] sm:$0xff] }
 0x476   :  { %1242 = vmatpush.bf16.msrb.mxu0 %v2615_v55  ;;  %v2644_v55 = vld [vmem:[#allocation13 + $0x10] sm:$0xff] }
 0x479   :  { %1433 = vmatpush.bf16.msrb.mxu1 %v2638_v20 }
 0x47a   :  { %1243 = vmatpush.bf16.msrb.mxu0 %v2614_v35 }
 0x47d   :  { %1434 = vmatpush.bf16.msrb.mxu1 %v2637_v21 }
 0x47e   :  { %1244 = vmatpush.bf16.msrb.mxu0 %v2613_v61  ;;  %v2655_v61 = vld [vmem:[#allocation14 + $0x28] sm:$0xff] }
 0x481   :  { %1435 = vmatpush.bf16.msrb.mxu1 %v2636_v24 }
 0x482   :  { %1245 = vmatpush.bf16.msrb.mxu0 %v2612_v0 }
 0x485   :  { %1436 = vmatpush.bf16.msrb.mxu1 %v2635_v25 }
 0x486   :  { %1246 = vmatpush.bf16.msrb.mxu0 %v2611_v2  ;;  %v2643_v2 = vld [vmem:[#allocation13 + $0x8] sm:$0xff] }
 0x489   :  { %1437 = vmatpush.bf16.msrb.mxu1 %v2634_v26  ;;  %v2651_v26 = vld [vmem:[#allocation14 + $0x8] sm:$0xff] }
 0x48a   :  { %1247 = vmatpush.bf16.msrb.mxu0 %v2610_v3 }
 0x48d   :  { %1248 = vmatmul.bf16.vlgmr.msrb.gmra.mxu0 %v1081_v54  ;;  %v2656_v54 = vld [vmem:[#allocation14 + $0x30] sm:$0xff] }
 0x48e   :  { %1621 = vmatpush.bf16.msra.mxu0 %v2657_v44 }
 0x492   :  { %1622 = vmatpush.bf16.msra.mxu0 %v2656_v54 }
 0x496   :  { %1623 = vmatpush.bf16.msra.mxu0 %v2655_v61 }
 0x49a   :  { %1624 = vmatpush.bf16.msra.mxu0 %v2654_v5 }
 0x49e   :  { %1625 = vmatpush.bf16.msra.mxu0 %v2653_v12 }
 0x4a2   :  { %1626 = vmatpush.bf16.msra.mxu0 %v2652_v58 }
 0x4a6   :  { %1627 = vmatpush.bf16.msra.mxu0 %v2651_v26 }
 0x4ea   :  { %v1107_v51 = vpop.f32.mrf.mxu0 }
 0x4f2   :  { %v1109_v10 = vpop.f32.mrf.mxu0 }
 0x4f3   :  { %v1112_v6 = vpack.c.bf16 %v1109_v10, %v1107_v51  ;;  %v2642_v10 = vld [vmem:[#allocation13] sm:$0xff] }
 0x4f5   :  { %1186 = vmatmul.bf16.vlgmr.msra.gmra.mxu1 %v1112_v6  ;;  %1261 = vmatpush.bf16.msrb.mxu2 %v1112_v6 }
 0x4f8   :  { %2361 = vmatmul.msk.bf16.vlgmr.msrb.gmra.mxu2 %vm464_vm11, %v3239_v16 }
 0x50a   :  { %v1249_v33 = vpop.f32.mrf.mxu0 }
 0x512   :  { %v1251_v31 = vpop.f32.mrf.mxu0 }
 0x572   :  { %v1187_v29 = vpop.f32.mrf.mxu1 }
 0x573   :  { %v1250_v36 = vadd.f32 %v1249_v33, %v1187_v29 }
 0x57a   :  { %v1189_v32 = vpop.f32.mrf.mxu1 }
 0x57b   :  { %v1263_v22 = vpop.f32.mrf.mxu2  ;;  %v1252_v47 = vadd.f32 %v1251_v31, %v1189_v32 }
 0x583   :  { %v1265_v1 = vpop.f32.mrf.mxu2 }
 0x584   :  { %v1268_v23 = vpack.c.bf16 %v1265_v1, %v1263_v22 }
 0x586   :  { %1342 = vmatmul.bf16.vlgmr.msra.gmra.mxu3 %v1268_v23  ;;  %1357 = vmatpush.bf16.msra.mxu2 %v1268_v23 }
 0x589   :  { %2394 = vmatmul.msk.bf16.vlgmr.msra.gmra.mxu2 %vm464_vm11, %v3239_v16  ;;  %v2647_v16 = vld [vmem:[#allocation13 + $0x28] sm:$0xff] }
 0x58a   :  { %1683 = vmatpush.bf16.msrb.mxu2 %v2649_v59  ;;  %v2650_v59 = vld [vmem:[#allocation14] sm:$0xff] }
 0x58b   :  { %1628 = vmatpush.bf16.msra.mxu0 %v2650_v59 }
 0x58e   :  { %1684 = vmatpush.bf16.msrb.mxu2 %v2648_v9 }
 0x592   :  { %1685 = vmatpush.bf16.msrb.mxu2 %v2647_v16 }
 0x596   :  { %1686 = vmatpush.bf16.msrb.mxu2 %v2646_v42 }
 0x59a   :  { %1687 = vmatpush.bf16.msrb.mxu2 %v2645_v49 }
 0x59e   :  { %1688 = vmatpush.bf16.msrb.mxu2 %v2644_v55 }
 0x5a2   :  { %1689 = vmatpush.bf16.msrb.mxu2 %v2643_v2 }
 0x5a6   :  { %1690 = vmatpush.bf16.msrb.mxu2 %v2642_v10 }
 0x5a9   :  { %1691 = vmatmul.bf16.vlgmr.msrb.gmra.mxu2 %v3215_v46 }
 0x609   :  { %v1343_v34 = vpop.f32.mrf.mxu3 }
 0x60a   :  { %v1348_v37 = vadd.f32 %v1343_v34, %v1250_v36 }
 0x60c   :  { %v1359_v27 = vpop.f32.mrf.mxu2 }
 0x611   :  { %v1345_v45 = vpop.f32.mrf.mxu3 }
 0x612   :  { %v1349_v52 = vadd.f32 %v1345_v45, %v1252_v47 }
 0x614   :  { %v1361_v28 = vpop.f32.mrf.mxu2 }
 0x615   :  { %v1364_v13 = vpack.c.bf16 %v1361_v28, %v1359_v27 }
 0x617   :  { %1438 = vmatmul.bf16.vlgmr.msrb.gmra.mxu1 %v1364_v13 }
 0x62c   :  { %v1692_v58 = vpop.f32.mrf.mxu2 }
 0x694   :  { %v1439_v40 = vpop.f32.mrf.mxu1 }
 0x695   :  { %v1444_v41 = vadd.f32 %v1439_v40, %v1348_v37 }
 0x697   :  { %v3298_v43 = vadd.f32 %v2694_v39, %v1444_v41 }
 0x699   :  { %v3301_v48 = vmul.f32 0.70710677, %v3298_v43 }
 0x69b   :  { %v1456_v53 = vmul.f32 %v3301_v48, %v3301_v48 }
 0x69c   :  { %v1441_v56 = vpop.f32.mrf.mxu1 }
 0x69d   :  { %v3305_v57 = vmin.f32 %v1456_v53, 16.0  ;;  %v1445_v38 = vadd.f32 %v1441_v56, %v1349_v52 }
 0x69f   :  { %v1458_v30 = vmul.f32 2.1237322e-06, %v3305_v57  ;;  %v1469_v35 = vmul.f32 3.8918573e-05, %v3305_v57  ;;  %v3309_v60 = vadd.f32 %v2694_v39, %v1445_v38 }
 0x6a1   :  { %v1459_v63 = vadd.f32 0.00028619796, %v1458_v30  ;;  %v1470_v0 = vadd.f32 0.001143296, %v1469_v35  ;;  %v3312_v3 = vmul.f32 0.70710677, %v3309_v60 }
 0x6a3   :  { %v1471_v4 = vmul.f32 %v1470_v0, %v3305_v57  ;;  %v1496_v7 = vmul.f32 %v3312_v3, %v3312_v3  ;;  %v1460_v51 = vmul.f32 %v1459_v63, %v3305_v57 }
 0x6a5   :  { %v1472_v8 = vadd.f32 0.014752088, %v1471_v4  ;;  %v1497_v11 = vmin.f32 %v1496_v7, 16.0  ;;  %v1461_v62 = vadd.f32 0.0036580483, %v1460_v51 }
 0x6a7   :  { %v1473_v6 = vmul.f32 %v1472_v8, %v3305_v57  ;;  %v1498_v14 = vmul.f32 2.1237322e-06, %v1497_v11  ;;  %v1509_v15 = vmul.f32 3.8918573e-05, %v1497_v11  ;;  %v1462_v22 = vmul.f32 %v1461_v62, %v3305_v57 }
 0x6a8   :  { %v1453_v62 = vmul.f32 0.5, %v3309_v60  ;;  %v2664_v60 = vld [vmem:[#allocation16 + $0x30] sm:$0xff] }
 0x6a9   :  { %v1474_v17 = vadd.f32 0.112945676, %v1473_v6  ;;  %v1499_v50 = vadd.f32 0.00028619796, %v1498_v14  ;;  %v1510_v18 = vadd.f32 0.001143296, %v1509_v15 }
 0x6aa   :  { %v1463_v28 = vadd.f32 0.05243302, %v1462_v22  ;;  %v1452_v15 = vmul.f32 0.5, %v3298_v43 }
 0x6ab   :  { %v1475_v19 = vmul.f32 %v1474_v17, %v3305_v57  ;;  %v1500_v20 = vmul.f32 %v1499_v50, %v1497_v11  ;;  %v1511_v21 = vmul.f32 %v1510_v18, %v1497_v11 }
 0x6ac   :  { %v1464_v9 = vmul.f32 %v1463_v28, %v3305_v57 }
 0x6ad   :  { %v1476_v1 = vadd.f32 0.4994258, %v1475_v19  ;;  %v1501_v23 = vadd.f32 0.0036580483, %v1500_v20  ;;  %v1512_v24 = vadd.f32 0.014752088, %v1511_v21 }
 0x6ae   :  { %v1465_v37 = vadd.f32 0.18741608, %v1464_v9 }
 0x6af   :  { %v1477_v25 = vmul.f32 %v1476_v1, %v3305_v57  ;;  %v1513_v27 = vmul.f32 %v1512_v24, %v1497_v11  ;;  %v1502_v29 = vmul.f32 %v1501_v23, %v1497_v11  ;;  %v2665_v1 = vld [vmem:[#allocation16 + $0x38] sm:$0xff] }
 0x6b0   :  { %v1466_v44 = vmul.f32 %v1465_v37, %v3305_v57  ;;  %1860 = vmatpush.bf16.msrb.mxu3 %v2665_v1 }
 0x6b1   :  { %v1478_v13 = vadd.f32 1.0, %v1477_v25  ;;  %v1514_v46 = vadd.f32 0.112945676, %v1513_v27  ;;  %v1503_v33 = vadd.f32 0.05243302, %v1502_v29  ;;  %v1694_v25 = vpop.f32.mrf.mxu2 }
 0x6b2   :  { %v1467_v53 = vadd.f32 1.1283791, %v1466_v44 }
 0x6b3   :  { %2712 = vrcp.f32 %v1478_v13  ;;  %v1515_v32 = vmul.f32 %v1514_v46, %v1497_v11  ;;  %v1504_v40 = vmul.f32 %v1503_v33, %v1497_v11  ;;  %v1490_v45 = vand.u32 2147483648, %v1478_v13  ;;  %v2663_v46 = vld [vmem:[#allocation16 + $0x28] sm:$0xff] }
 0x6b4   :  { %v1488_v49 = vand.u32 2147483647, %v1478_v13  ;;  %vm1484_vm13 = vweird.f32 %v1478_v13  ;;  %v1468_v61 = vmul.f32 %v1467_v53, %v3301_v48  ;;  %1861 = vmatpush.bf16.msrb.mxu3 %v2664_v60  ;;  %v2660_v53 = vld [vmem:[#allocation16 + $0x10] sm:$0xff] }
 0x6b5   :  { %v1516_v34 = vadd.f32 0.4994258, %v1515_v32  ;;  %v1505_v47 = vadd.f32 0.18741608, %v1504_v40  ;;  %v1491_v38 = vor.u32 1.1754944e-38, %v1490_v45 }
 0x6b6   :  { %vm1489_vm15 = vcmp.eq.f32.partialorder %v1488_v49, 8.507059e+37 }
 0x6b7   :  { %v1517_v36 = vmul.f32 %v1516_v34, %v1497_v11  ;;  %v1506_v55 = vmul.f32 %v1505_v47, %v1497_v11  ;;  %v2662_v34 = vld [vmem:[#allocation16 + $0x20] sm:$0xff] }
 0x6b8   :  { %1862 = vmatpush.bf16.msrb.mxu3 %v2663_v46 }
 0x6b9   :  { %v2713_v16 = vpop.eup %2712  ;;  %v1518_v41 = vadd.f32 1.0, %v1517_v36  ;;  %v1507_v57 = vadd.f32 1.1283791, %v1506_v55 }
 0x6ba   :  { %v1480_v39 = vmul.f32 %v2713_v16, %v1478_v13  ;;  %vm1485_vm11 = vweird.f32 %v2713_v16 }
 0x6bb   :  { %2714 = vrcp.f32 %v1518_v41  ;;  %vm1486_vm14 = vmor %vm1484_vm13, %vm1485_vm11  ;;  %v1530_v0 = vand.u32 2147483648, %v1518_v41  ;;  %v1528_v5 = vand.u32 2147483647, %v1518_v41  ;;  %vm1524_vm1 = vweird.f32 %v1518_v41 }
 0x6bc   :  { %v1481_v42 = vsub.f32 1.0, %v1480_v39  ;;  %v1508_v10 = vmul.f32 %v1507_v57, %v3312_v3  ;;  %v2695_v3 = vld [vmem:[%s3402_s14] ss:$0 sm:$0xff]  ;;  %1863 = vmatpush.bf16.msrb.mxu3 %v2662_v34 }
 0x6bd   :  { %v1531_v51 = vor.u32 1.1754944e-38, %v1530_v0  ;;  %vm1529_vm3 = vcmp.eq.f32.partialorder %v1528_v5, 8.507059e+37 }
 0x6be   :  { %v1482_v31 = vmul.f32 %v2713_v16, %v1481_v42 }
 0x6c0   :  { %v1483_v52 = vadd.f32 %v2713_v16, %v1482_v31 }
 0x6c1   :  { %v2715_v54 = vpop.eup %2714 }
 0x6c2   :  { %v1487_v56 = vsel %vm1486_vm14, %v2713_v16, %v1483_v52  ;;  %v1520_v30 = vmul.f32 %v2715_v54, %v1518_v41  ;;  %vm1525_vm0 = vweird.f32 %v2715_v54  ;;  %v2661_v41 = vld [vmem:[#allocation16 + $0x18] sm:$0xff] }
 0x6c3   :  { %v1492_v35 = vsel %vm1489_vm15, %v1491_v38, %v1487_v56  ;;  %vm1526_vm2 = vmor %vm1524_vm1, %vm1525_vm0  ;;  %1864 = vmatpush.bf16.msrb.mxu3 %v2661_v41 }
 0x6c4   :  { %v1521_v63 = vsub.f32 1.0, %v1520_v30  ;;  %v1493_v2 = vmul.f32 %v1492_v35, %v1468_v61 }
 0x6c6   :  { %v1522_v4 = vmul.f32 %v2715_v54, %v1521_v63  ;;  %v2427_v8 = vclamps-f32 %v1493_v2, 1.0  ;;  %v2659_v63 = vld [vmem:[#allocation16 + $0x8] sm:$0xff] }
 0x6c7   :  { %1865 = vmatpush.bf16.msrb.mxu3 %v2660_v53  ;;  %v2696_v53 = vld [vmem:[%s3404_s16] ss:$0 sm:$0xff]  ;;  %s3042_s16 = smov [#allocation19]  }
 0x6c8   :  { %v1523_v7 = vadd.f32 %v2715_v54, %v1522_v4  ;;  %v1536_v14 = vadd.f32 1.0, %v2427_v8  ;;  %s2053_s12 = sshll.u32 %s3042_s16, 4  ;;  %s2054_s12 = int_to_ptr.vmem [resolvable:$true] %s2053_s12 }
 0x6ca   :  { %v1527_v11 = vsel %vm1526_vm2, %v2715_v54, %v1523_v7  ;;  %v1538_v50 = vmul.f32 %v1536_v14, %v1452_v15  ;;  %v2658_v7 = vld [vmem:[#allocation16] sm:$0xff] }
 0x6cb   :  { %v1532_v6 = vsel %vm1529_vm3, %v1531_v51, %v1527_v11  ;;  %1866 = vmatpush.bf16.msrb.mxu3 %v2659_v63 }
 0x6cc   :  { %v1533_v12 = vmul.f32 %v1532_v6, %v1508_v10 }
 0x6ce   :  { %v2428_v48 = vclamps-f32 %v1533_v12, 1.0 }
 0x6cf   :  { %1867 = vmatpush.bf16.msrb.mxu3 %v2658_v7  ;;  %v2670_v7 = vld [vmem:[#allocation17 + $0x20] sm:$0xff] }
 0x6d0   :  { %v1537_v17 = vadd.f32 1.0, %v2428_v48 }
 0x6d2   :  { %v1539_v18 = vmul.f32 %v1537_v17, %v1453_v62 }
 0x6d4   :  { %v1540_v19 = vpack.c.bf16 %v1539_v18, %v1538_v50 }
 0x6d6   :  { %1629 = vmatmul.bf16.vlgmr.msra.gmra.mxu0 %v1540_v19 }
 0x753   :  { %v1630_v20 = vpop.f32.mrf.mxu0 }
 0x754   :  { %v1693_v21 = vadd.f32 %v1692_v58, %v1630_v20 }
 0x756   :  { %v3332_v22 = vadd.f32 %v2695_v3, %v1693_v21 }
 0x758   :  { %v3335_v23 = vmul.f32 0.70710677, %v3332_v22 }
 0x75a   :  { %v1707_v43 = vmul.f32 %v3335_v23, %v3335_v23 }
 0x75b   :  { %v1632_v24 = vpop.f32.mrf.mxu0 }
 0x75c   :  { %v1708_v26 = vmin.f32 %v1707_v43, 16.0  ;;  %v1695_v27 = vadd.f32 %v1694_v25, %v1632_v24 }
 0x75e   :  { %v1709_v28 = vmul.f32 2.1237322e-06, %v1708_v26  ;;  %v1720_v13 = vmul.f32 3.8918573e-05, %v1708_v26  ;;  %v3339_v29 = vadd.f32 %v2695_v3, %v1695_v27 }
 0x760   :  { %v1710_v59 = vadd.f32 0.00028619796, %v1709_v28  ;;  %v1721_v32 = vadd.f32 0.001143296, %v1720_v13  ;;  %v3342_v9 = vmul.f32 0.70710677, %v3339_v29 }
 0x762   :  { %v1722_v33 = vmul.f32 %v1721_v32, %v1708_v26  ;;  %v1747_v36 = vmul.f32 %v3342_v9, %v3342_v9  ;;  %v1711_v16 = vmul.f32 %v1710_v59, %v1708_v26 }
 0x764   :  { %v1723_v37 = vadd.f32 0.014752088, %v1722_v33  ;;  %v1748_v39 = vmin.f32 %v1747_v36, 16.0  ;;  %v1712_v31 = vadd.f32 0.0036580483, %v1711_v16 }
 0x766   :  { %v1724_v40 = vmul.f32 %v1723_v37, %v1708_v26  ;;  %v1749_v42 = vmul.f32 2.1237322e-06, %v1748_v39  ;;  %v1760_v44 = vmul.f32 3.8918573e-05, %v1748_v39  ;;  %v1713_v38 = vmul.f32 %v1712_v31, %v1708_v26 }
 0x767   :  { %v1704_v31 = vmul.f32 0.5, %v3339_v29  ;;  %v2672_v29 = vld [vmem:[#allocation17 + $0x30] sm:$0xff] }
 0x768   :  { %v1725_v45 = vadd.f32 0.112945676, %v1724_v40  ;;  %v1750_v47 = vadd.f32 0.00028619796, %v1749_v42  ;;  %v1761_v49 = vadd.f32 0.001143296, %v1760_v44 }
 0x769   :  { %v1714_v0 = vadd.f32 0.05243302, %v1713_v38  ;;  %v1703_v44 = vmul.f32 0.5, %v3332_v22 }
 0x76a   :  { %v1726_v52 = vmul.f32 %v1725_v45, %v1708_v26  ;;  %v1751_v54 = vmul.f32 %v1750_v47, %v1748_v39  ;;  %v1762_v56 = vmul.f32 %v1761_v49, %v1748_v39 }
 0x76b   :  { %v1715_v8 = vmul.f32 %v1714_v0, %v1708_v26 }
 0x76c   :  { %v1727_v55 = vadd.f32 0.4994258, %v1726_v52  ;;  %v1752_v30 = vadd.f32 0.0036580483, %v1751_v54  ;;  %v1763_v35 = vadd.f32 0.014752088, %v1762_v56 }
 0x76d   :  { %v1716_v14 = vadd.f32 0.18741608, %v1715_v8  ;;  %v2673_v56 = vld [vmem:[#allocation17 + $0x38] sm:$0xff] }
 0x76e   :  { %v1728_v61 = vmul.f32 %v1727_v55, %v1708_v26  ;;  %v1764_v57 = vmul.f32 %v1763_v35, %v1748_v39  ;;  %v1753_v4 = vmul.f32 %v1752_v30, %v1748_v39  ;;  %2033 = vmatpush.bf16.msra.mxu1 %v2673_v56 }
 0x76f   :  { %v1717_v50 = vmul.f32 %v1716_v14, %v1708_v26 }
 0x770   :  { %v1729_v2 = vadd.f32 1.0, %v1728_v61  ;;  %v1765_v5 = vadd.f32 0.112945676, %v1764_v57  ;;  %v1754_v10 = vadd.f32 0.05243302, %v1753_v4  ;;  %v2671_v57 = vld [vmem:[#allocation17 + $0x28] sm:$0xff] }
 0x771   :  { %v1718_v21 = vadd.f32 1.1283791, %v1717_v50 }
 0x772   :  { %2716 = vrcp.f32 %v1729_v2  ;;  %v1766_v51 = vmul.f32 %v1765_v5, %v1748_v39  ;;  %v1755_v15 = vmul.f32 %v1754_v10, %v1748_v39  ;;  %v1741_v19 = vand.u32 2147483648, %v1729_v2  ;;  %2034 = vmatpush.bf16.msra.mxu1 %v2672_v29 }
 0x773   :  { %v1739_v3 = vand.u32 2147483647, %v1729_v2  ;;  %vm1735_vm5 = vweird.f32 %v1729_v2  ;;  %v1719_v28 = vmul.f32 %v1718_v21, %v3335_v23 }
 0x774   :  { %v1767_v11 = vadd.f32 0.4994258, %v1766_v51  ;;  %v1756_v58 = vadd.f32 0.18741608, %v1755_v15  ;;  %v1742_v60 = vor.u32 1.1754944e-38, %v1741_v19  ;;  %v2668_v19 = vld [vmem:[#allocation17 + $0x10] sm:$0xff] }
 0x775   :  { %vm1740_vm7 = vcmp.eq.f32.partialorder %v1739_v3, 8.507059e+37 }
 0x776   :  { %v1768_v6 = vmul.f32 %v1767_v11, %v1748_v39  ;;  %v1757_v24 = vmul.f32 %v1756_v58, %v1748_v39  ;;  %2035 = vmatpush.bf16.msra.mxu1 %v2671_v57 }
 0x778   :  { %v2717_v12 = vpop.eup %2716  ;;  %v1769_v62 = vadd.f32 1.0, %v1768_v6  ;;  %v1758_v26 = vadd.f32 1.1283791, %v1757_v24  ;;  %v2667_v24 = vld [vmem:[#allocation17 + $0x8] sm:$0xff] }
 0x779   :  { %v1731_v48 = vmul.f32 %v2717_v12, %v1729_v2  ;;  %vm1736_vm4 = vweird.f32 %v2717_v12 }
 0x77a   :  { %2718 = vrcp.f32 %v1769_v62  ;;  %vm1737_vm6 = vmor %vm1735_vm5, %vm1736_vm4  ;;  %v1781_v46 = vand.u32 2147483648, %v1769_v62  ;;  %v1779_v33 = vand.u32 2147483647, %v1769_v62  ;;  %vm1775_vm9 = vweird.f32 %v1769_v62  ;;  %2036 = vmatpush.bf16.msra.mxu1 %v2670_v7 }
 0x77b   :  { %v1732_v17 = vsub.f32 1.0, %v1731_v48  ;;  %v1759_v37 = vmul.f32 %v1758_v26, %v3342_v9 }
 0x77c   :  { %v1782_v36 = vor.u32 1.1754944e-38, %v1781_v46  ;;  %vm1780_vm12 = vcmp.eq.f32.partialorder %v1779_v33, 8.507059e+37  ;;  %v2666_v46 = vld [vmem:[#allocation17] sm:$0xff] }
 0x77d   :  { %v1733_v18 = vmul.f32 %v2717_v12, %v1732_v17 }
 0x77f   :  { %v1734_v20 = vadd.f32 %v2717_v12, %v1733_v18 }
 0x780   :  { %v2719_v1 = vpop.eup %2718 }
 0x781   :  { %v1738_v43 = vsel %vm1737_vm6, %v2717_v12, %v1734_v20  ;;  %v1771_v25 = vmul.f32 %v2719_v1, %v1769_v62  ;;  %vm1776_vm8 = vweird.f32 %v2719_v1  ;;  %v2669_v12 = vld [vmem:[#allocation17 + $0x18] sm:$0xff] }
 0x782   :  { %v1743_v27 = vsel %vm1740_vm7, %v1742_v60, %v1738_v43  ;;  %vm1777_vm10 = vmor %vm1775_vm9, %vm1776_vm8  ;;  %2037 = vmatpush.bf16.msra.mxu1 %v2669_v12 }
 0x783   :  { %v1772_v13 = vsub.f32 1.0, %v1771_v25  ;;  %v1744_v59 = vmul.f32 %v1743_v27, %v1719_v28 }
 0x785   :  { %v1773_v32 = vmul.f32 %v2719_v1, %v1772_v13  ;;  %v2493_v16 = vclamps-f32 %v1744_v59, 1.0 }
 0x786   :  { %2038 = vmatpush.bf16.msra.mxu1 %v2668_v19 }
 0x787   :  { %v1774_v34 = vadd.f32 %v2719_v1, %v1773_v32  ;;  %v1787_v42 = vadd.f32 1.0, %v2493_v16 }
 0x789   :  { %v1778_v39 = vsel %vm1777_vm10, %v2719_v1, %v1774_v34  ;;  %v1789_v47 = vmul.f32 %v1787_v42, %v1703_v44 }
 0x78a   :  { %v1783_v40 = vsel %vm1780_vm12, %v1782_v36, %v1778_v39  ;;  %2039 = vmatpush.bf16.msra.mxu1 %v2667_v24 }
 0x78b   :  { %v1784_v41 = vmul.f32 %v1783_v40, %v1759_v37 }
 0x78d   :  { %v2494_v23 = vclamps-f32 %v1784_v41, 1.0 }
 0x78e   :  { %2040 = vmatpush.bf16.msra.mxu1 %v2666_v46 }
 0x78f   :  { %v1788_v45 = vadd.f32 1.0, %v2494_v23 }
 0x791   :  { %v1790_v49 = vmul.f32 %v1788_v45, %v1704_v31 }
 0x793   :  { %v1791_v52 = vpack.c.bf16 %v1790_v49, %v1789_v47 }
 0x795   :  { %1868 = vmatmul.bf16.vlgmr.msrb.gmra.mxu3 %v1791_v52 }
 0x818   :  { %v1869_v9 = vpop.f32.mrf.mxu3 }
 0x819   :  { %v3353_v54 = vadd.f32 %v2696_v53, %v1869_v9 }
 0x81b   :  { %1874 = vst [vmem:[#allocation19] sm:$0xff] %v3353_v54  ;;  %v3357_v38 = vmul.f32 0.70710677, %v3353_v54 }
 0x81d   :  { %v1880_v22 = vmul.f32 %v3357_v38, %v3357_v38 }
 0x81f   :  { %v1881_v55 = vmin.f32 %v1880_v22, 16.0 }
 0x820   :  { %v1871_v30 = vpop.f32.mrf.mxu3 }
 0x821   :  { %v1882_v35 = vmul.f32 2.1237322e-06, %v1881_v55  ;;  %v1893_v61 = vmul.f32 3.8918573e-05, %v1881_v55  ;;  %v3361_v63 = vadd.f32 %v2696_v53, %v1871_v30 }
 0x823   :  { %v1883_v0 = vadd.f32 0.00028619796, %v1882_v35  ;;  %v1894_v2 = vadd.f32 0.001143296, %v1893_v61  ;;  %1875 = vst [vmem:[#allocation19 + $0x8] sm:$0xff] %v3361_v63 }
 0x824   :  { %v3365_v4 = vmul.f32 0.70710677, %v3361_v63  ;;  %2061 = dma.vmem_to_hbm [thread:$0]  %s2054_s12, 256, %s2056_s25, [#allocation4], %s3035_s1, %s3035_s1, %s3036_s2  }
 0x825   :  { %v1895_v5 = vmul.f32 %v1894_v2, %v1881_v55  ;;  %v1884_v8 = vmul.f32 %v1883_v0, %v1881_v55 }
 0x826   :  { %v1920_v51 = vmul.f32 %v3365_v4, %v3365_v4 }
 0x827   :  { %v1896_v10 = vadd.f32 0.014752088, %v1895_v5  ;;  %v1885_v15 = vadd.f32 0.0036580483, %v1884_v8 }
 0x828   :  { %v1921_v11 = vmin.f32 %v1920_v51, 16.0 }
 0x829   :  { %v1897_v6 = vmul.f32 %v1896_v10, %v1881_v55  ;;  %v1886_v20 = vmul.f32 %v1885_v15, %v1881_v55  ;;  %v1877_v15 = vmul.f32 0.5, %v3361_v63 }
 0x82a   :  { %v1922_v14 = vmul.f32 2.1237322e-06, %v1921_v11  ;;  %v1933_v48 = vmul.f32 3.8918573e-05, %v1921_v11 }
 0x82b   :  { %v1898_v62 = vadd.f32 0.112945676, %v1897_v6  ;;  %v1887_v27 = vadd.f32 0.05243302, %v1886_v20 }
 0x82c   :  { %v1923_v17 = vadd.f32 0.00028619796, %v1922_v14  ;;  %v1934_v50 = vadd.f32 0.001143296, %v1933_v48  ;;  %v1876_v48 = vmul.f32 0.5, %v3353_v54 }
 0x82d   :  { %v1899_v18 = vmul.f32 %v1898_v62, %v1881_v55  ;;  %v1888_v32 = vmul.f32 %v1887_v27, %v1881_v55  ;;  %v2697_v54 = vld [vmem:[%s3406_s18] ss:$0 sm:$0xff] }
 0x82e   :  { %v1924_v58 = vmul.f32 %v1923_v17, %v1921_v11  ;;  %v1935_v3 = vmul.f32 %v1934_v50, %v1921_v11 }
 0x82f   :  { %v1900_v21 = vadd.f32 0.4994258, %v1899_v18  ;;  %v1889_v37 = vadd.f32 0.18741608, %v1888_v32 }
 0x830   :  { %v1925_v1 = vadd.f32 0.0036580483, %v1924_v58  ;;  %v1936_v43 = vadd.f32 0.014752088, %v1935_v3 }
 0x831   :  { %v1901_v60 = vmul.f32 %v1900_v21, %v1881_v55  ;;  %v1890_v23 = vmul.f32 %v1889_v37, %v1881_v55 }
 0x832   :  { %v1937_v25 = vmul.f32 %v1936_v43, %v1921_v11  ;;  %v1926_v13 = vmul.f32 %v1925_v1, %v1921_v11 }
 0x833   :  { %v1902_v28 = vadd.f32 1.0, %v1901_v60  ;;  %v1891_v52 = vadd.f32 1.1283791, %v1890_v23 }
 0x834   :  { %v1938_v26 = vadd.f32 0.112945676, %v1937_v25  ;;  %v1927_v33 = vadd.f32 0.05243302, %v1926_v13 }
 0x835   :  { %2720 = vrcp.f32 %v1902_v28  ;;  %v1914_v31 = vand.u32 2147483648, %v1902_v28  ;;  %v1912_v47 = vand.u32 2147483647, %v1902_v28  ;;  %vm1908_vm13 = vweird.f32 %v1902_v28 }
 0x836   :  { %v1939_v59 = vmul.f32 %v1938_v26, %v1921_v11  ;;  %v1928_v40 = vmul.f32 %v1927_v33, %v1921_v11  ;;  %v1892_v35 = vmul.f32 %v1891_v52, %v3357_v38 }
 0x837   :  { %v1915_v56 = vor.u32 1.1754944e-38, %v1914_v31  ;;  %vm1913_vm15 = vcmp.eq.f32.partialorder %v1912_v47, 8.507059e+37 }
 0x838   :  { %v1940_v34 = vadd.f32 0.4994258, %v1939_v59  ;;  %v1929_v45 = vadd.f32 0.18741608, %v1928_v40 }
 0x83a   :  { %v1941_v36 = vmul.f32 %v1940_v34, %v1921_v11  ;;  %v1930_v22 = vmul.f32 %v1929_v45, %v1921_v11 }
 0x83b   :  { %v2721_v16 = vpop.eup %2720 }
 0x83c   :  { %v1904_v39 = vmul.f32 %v2721_v16, %v1902_v28  ;;  %v1942_v41 = vadd.f32 1.0, %v1941_v36  ;;  %vm1909_vm11 = vweird.f32 %v2721_v16  ;;  %v1931_v55 = vadd.f32 1.1283791, %v1930_v22 }
 0x83d   :  { %vm1910_vm14 = vmor %vm1908_vm13, %vm1909_vm11 }
 0x83e   :  { %v1905_v42 = vsub.f32 1.0, %v1904_v39  ;;  %2722 = vrcp.f32 %v1942_v41  ;;  %v1954_v57 = vand.u32 2147483648, %v1942_v41  ;;  %v1952_v5 = vand.u32 2147483647, %v1942_v41 }
 0x83f   :  { %vm1948_vm1 = vweird.f32 %v1942_v41  ;;  %v1932_v10 = vmul.f32 %v1931_v55, %v3365_v4 }
 0x840   :  { %v1906_v44 = vmul.f32 %v2721_v16, %v1905_v42  ;;  %v1955_v51 = vor.u32 1.1754944e-38, %v1954_v57  ;;  %vm1953_vm3 = vcmp.eq.f32.partialorder %v1952_v5, 8.507059e+37 }
 0x842   :  { %v1907_v49 = vadd.f32 %v2721_v16, %v1906_v44 }
 0x844   :  { %v2723_v53 = vpop.eup %2722  ;;  %v1911_v9 = vsel %vm1910_vm14, %v2721_v16, %v1907_v49 }
 0x845   :  { %v1944_v29 = vmul.f32 %v2723_v53, %v1942_v41  ;;  %v1916_v30 = vsel %vm1913_vm15, %v1915_v56, %v1911_v9  ;;  %vm1949_vm0 = vweird.f32 %v2723_v53 }
 0x846   :  { %v1917_v0 = vmul.f32 %v1916_v30, %v1892_v35  ;;  %vm1950_vm2 = vmor %vm1948_vm1, %vm1949_vm0 }
 0x847   :  { %v1945_v61 = vsub.f32 1.0, %v1944_v29 }
 0x848   :  { %v2527_v8 = vclamps-f32 %v1917_v0, 1.0 }
 0x849   :  { %v1946_v2 = vmul.f32 %v2723_v53, %v1945_v61 }
 0x84a   :  { %v1960_v14 = vadd.f32 1.0, %v2527_v8 }
 0x84b   :  { %v1947_v7 = vadd.f32 %v2723_v53, %v1946_v2 }
 0x84c   :  { %v1962_v17 = vmul.f32 %v1960_v14, %v1876_v48 }
 0x84d   :  { %v1951_v11 = vsel %vm1950_vm2, %v2723_v53, %v1947_v7 }
 0x84e   :  { %v1956_v6 = vsel %vm1953_vm3, %v1955_v51, %v1951_v11 }
 0x84f   :  { %v1957_v12 = vmul.f32 %v1956_v6, %v1932_v10 }
 0x851   :  { %v2528_v38 = vclamps-f32 %v1957_v12, 1.0 }
 0x853   :  { %v1961_v62 = vadd.f32 1.0, %v2528_v38 }
 0x855   :  { %v1963_v50 = vmul.f32 %v1961_v62, %v1877_v15 }
 0x857   :  { %v1964_v18 = vpack.c.bf16 %v1963_v50, %v1962_v17 }
 0x859   :  { %2041 = vmatmul.bf16.vlgmr.msra.gmra.mxu1 %v1964_v18 }
 0x8d6   :  { %v2042_v63 = vpop.f32.mrf.mxu1 }
 0x8d7   :  { %v2043_v4 = vadd.f32 %v2697_v54, %v2042_v63 }
 0x8d9   :  { %2047 = vst [vmem:[#allocation20] sm:$0xff] %v2043_v4 }
 0x8de   :  { %v2044_v19 = vpop.f32.mrf.mxu1 }
 0x8df   :  { %v2045_v58 = vadd.f32 %v2697_v54, %v2044_v19 }
 0x8e1   :  { %2048 = vst [vmem:[#allocation20 + $0x8] sm:$0xff] %v2045_v58 }
 0x8e2   :  { %2074 = dma.vmem_to_hbm [thread:$0]  %s2067_s17, 256, %s2069_s10, [#allocation21], %s3035_s1, %s3035_s1, %s3036_s2  }
 0x8e3   :  { %3024 = dma.done.wait [#allocation4], 256  }
 0x8e4   :  { %3025 = vsyncadd [#allocation4], 4294967040 }
 0x8e5   :  { %3026 = dma.done.wait [#allocation21], 256  }
 0x8e6   :  { %3027 = vsyncadd [#allocation21], 4294967040 }
 0x8e7   :  { %2083 = vsyncpa [#allocation3], 1 }
 0x8e8   :  { %2084 = vsyncpa [#allocation6], 1 }
 0x8e9   :  { %2085 = vsyncpa [#allocation9], 1 }
 0x8ea   :  { %2086 = vsyncpa [#allocation12], 1 }
 0x8eb   :  { %2087 = vsyncpa [#allocation15], 1 }
 0x8ec   :  { %2088 = vsyncpa [#allocation18], 1 }
 0x8ed   :  { %2089 = vsyncpa [#allocation4], 1 }
 0x8ee   :  { %2090 = vsyncpa [#allocation21], 1 }

</bundles_post_ra>
